<compile_context>
chip_gen: v7x
topology: tpu7x:2x2x1
jax: 0.10.0
libtpu: 0.0.40
codegen_flags: <defaults>
</compile_context>

<pallas_src>
import math

import jax
import jax.numpy as jnp
from jax.experimental import pallas as pl
from jax.experimental.pallas import tpu as pltpu


# ----------------------------- kernels -------------------------------------


def _feat_transform_kernel(x_ref, w_ref, o_ref):
    # S_tile = X_tile @ W   (bf16 inputs, f32 accumulation, bf16 out)
    o_ref[...] = jnp.dot(
        x_ref[...], w_ref[...], preferred_element_type=jnp.float32
    ).astype(o_ref.dtype)


def _fused_agg_transform_kernel(adj_ref, s1_ref, b1_ref, w2_ref, o_ref):
    # S2_tile = relu(adj_tile @ S1 + b1) @ W2   (h1 never leaves VMEM/registers)
    h1 = jnp.dot(adj_ref[...], s1_ref[...], preferred_element_type=jnp.float32)
    h1 = jnp.maximum(h1 + b1_ref[...], 0.0).astype(jnp.bfloat16)
    s2 = jnp.dot(h1, w2_ref[...], preferred_element_type=jnp.float32)
    o_ref[...] = s2.astype(o_ref.dtype)


def _final_agg_kernel(adj_ref, s2_ref, b2_ref, o_ref):
    # out_tile = log_softmax(adj_tile @ S2 + b2)
    h = jnp.dot(adj_ref[...], s2_ref[...], preferred_element_type=jnp.float32)
    # padded class columns carry a -1e30 bias (f32) -> exp() == 0, so the
    # reduction over the padded 128-wide class axis equals the true one.
    h = h + b2_ref[...]
    m = jnp.max(h, axis=-1, keepdims=True)
    shifted = h - m
    lse = jnp.log(jnp.sum(jnp.exp(shifted), axis=-1, keepdims=True))
    o_ref[...] = (shifted - lse).astype(o_ref.dtype)


def _gcn_single_kernel(x_ref, adj_ref, w1_ref, b1_ref, w2_ref, b2_ref, o_ref):
    # Whole forward in one VMEM-resident shot (small graphs, trivial grid).
    bf16 = jnp.bfloat16
    s1 = jnp.dot(
        x_ref[...], w1_ref[...], preferred_element_type=jnp.float32
    ).astype(bf16)
    h1 = jnp.dot(adj_ref[...], s1, preferred_element_type=jnp.float32)
    h1 = jnp.maximum(h1 + b1_ref[...], 0.0).astype(bf16)
    s2 = jnp.dot(h1, w2_ref[...], preferred_element_type=jnp.float32).astype(bf16)
    h2 = jnp.dot(adj_ref[...], s2, preferred_element_type=jnp.float32)
    h2 = h2 + b2_ref[...]
    m = jnp.max(h2, axis=-1, keepdims=True)
    shifted = h2 - m
    lse = jnp.log(jnp.sum(jnp.exp(shifted), axis=-1, keepdims=True))
    o_ref[...] = (shifted - lse).astype(o_ref.dtype)


# ----------------------------- wrapper --------------------------------------


def _round_up(x: int, m: int) -> int:
    return (x + m - 1) // m * m


def _pad2d(a, rows, cols, fill=0.0):
    r, c = a.shape
    return jnp.pad(a, ((0, rows - r), (0, cols - c)), constant_values=fill)


def _vmem_limit_bytes() -> int:
    """Scoped VMEM limit: generous on 128-MiB parts, safe on 64-MiB parts."""
    try:
        kind = jax.devices()[0].device_kind.lower()
    except Exception:  # pragma: no cover - defensive
        kind = ""
    if "v5" in kind or "v6" in kind:
        return 100 * 1024 * 1024          # v5e / v6e: 128 MiB physical VMEM
    return 48 * 1024 * 1024               # v7x (64 MiB) / unknown: conservative


def _choose_tile_m(n, f_pad, h_pad, c_pad, vmem_limit) -> int:
    """Largest adj row tile whose per-call VMEM footprint fits the budget."""
    budget = int(vmem_limit * 0.85)
    for tm in (512, 256, 128):
        n_pad = _round_up(n, tm)
        adj = 2 * tm * n_pad * 2                                   # dbl-buffered
        fused = (adj + 2 * n_pad * h_pad * 2 + 2 * h_pad * c_pad * 2
                 + 2 * tm * c_pad * 2)
        final = adj + 2 * n_pad * c_pad * 2 + 2 * tm * c_pad * 4
        feat = 2 * tm * f_pad * 2 + 2 * f_pad * h_pad * 2 + 2 * tm * h_pad * 2
        if max(fused, final, feat) <= budget:
            return tm
    return 128


def gcn_forward(x, adj, w1, b1, w2, b2, *, tile_m=None, force_tiled=False):
    """2-layer GCN forward (relu + log_softmax) via Pallas TPU kernels."""
    n, nfeat = x.shape
    nhid = w1.shape[1]
    nclass = w2.shape[1]

    f_pad = _round_up(nfeat, 128)
    h_pad = _round_up(nhid, 128)
    c_pad = _round_up(nclass, 128)

    vmem_limit = _vmem_limit_bytes()
    use_single = (n <= 1024) and not force_tiled
    if tile_m is None:
        tile_m = _choose_tile_m(n, f_pad, h_pad, c_pad, vmem_limit)
    n_pad = _round_up(n, 128 if use_single else tile_m)

    bf16 = jnp.bfloat16
    x_p = _pad2d(x, n_pad, f_pad).astype(bf16)
    adj_p = _pad2d(adj, n_pad, n_pad).astype(bf16)
    w1_p = _pad2d(w1, f_pad, h_pad).astype(bf16)
    w2_p = _pad2d(w2, h_pad, c_pad).astype(bf16)
    b1_p = _pad2d(b1.reshape(1, -1).astype(jnp.float32), 1, h_pad)
    # Padded class columns get a huge negative bias so they vanish in softmax.
    b2_p = jnp.pad(
        b2.reshape(1, -1).astype(jnp.float32),
        ((0, 0), (0, c_pad - nclass)),
        constant_values=-1e30,
    )

    if use_single:
        # ---- single fused pallas_call: everything VMEM resident ----
        out_p = pl.pallas_call(
            _gcn_single_kernel,
            out_shape=jax.ShapeDtypeStruct((n_pad, c_pad), jnp.float32),
            compiler_params=pltpu.CompilerParams(vmem_limit_bytes=vmem_limit),
        )(x_p, adj_p, w1_p, b1_p, w2_p, b2_p)
        return out_p[:n, :nclass]

    n_tiles = n_pad // tile_m
    cparams = pltpu.CompilerParams(
        dimension_semantics=("parallel",),   # row tiles are independent
        vmem_limit_bytes=vmem_limit,
    )

    # ---- call 1: S1 = X @ W1  (X row-tiled, W1 grid-invariant / resident) ----
    s1 = pl.pallas_call(
        _feat_transform_kernel,
        out_shape=jax.ShapeDtypeStruct((n_pad, h_pad), bf16),
        grid=(n_tiles,),
        in_specs=[
            pl.BlockSpec((tile_m, f_pad), lambda i: (i, 0)),    # X row tile
            pl.BlockSpec((f_pad, h_pad), lambda i: (0, 0)),     # W1 (resident)
        ],
        out_specs=pl.BlockSpec((tile_m, h_pad), lambda i: (i, 0)),
        compiler_params=cparams,
        cost_estimate=pl.CostEstimate(
            flops=2 * n_pad * f_pad * h_pad,
            transcendentals=0,
            bytes_accessed=2 * (n_pad * f_pad + f_pad * h_pad + n_pad * h_pad),
        ),
    )(x_p, w1_p)

    # ---- call 2 (fused): S2 = relu(adj @ S1 + b1) @ W2  (adj row-tiled) ----
    s2 = pl.pallas_call(
        _fused_agg_transform_kernel,
        out_shape=jax.ShapeDtypeStruct((n_pad, c_pad), bf16),
        grid=(n_tiles,),
        in_specs=[
            pl.BlockSpec((tile_m, n_pad), lambda i: (i, 0)),    # adj row tile
            pl.BlockSpec((n_pad, h_pad), lambda i: (0, 0)),     # S1 (resident)
            pl.BlockSpec((1, h_pad), lambda i: (0, 0)),         # b1 (f32)
            pl.BlockSpec((h_pad, c_pad), lambda i: (0, 0)),     # W2 (resident)
        ],
        out_specs=pl.BlockSpec((tile_m, c_pad), lambda i: (i, 0)),
        compiler_params=cparams,
        cost_estimate=pl.CostEstimate(
            flops=2 * n_pad * n_pad * h_pad + 2 * n_pad * h_pad * c_pad,
            transcendentals=0,
            bytes_accessed=2 * (n_pad * n_pad + n_pad * h_pad + h_pad * c_pad
                                + n_pad * c_pad) + 4 * h_pad,
        ),
    )(adj_p, s1, b1_p, w2_p)

    # ---- call 3: out = log_softmax(adj @ S2 + b2)  (adj row-tiled) ----
    out_p = pl.pallas_call(
        _final_agg_kernel,
        out_shape=jax.ShapeDtypeStruct((n_pad, c_pad), jnp.float32),
        grid=(n_tiles,),
        in_specs=[
            pl.BlockSpec((tile_m, n_pad), lambda i: (i, 0)),    # adj row tile
            pl.BlockSpec((n_pad, c_pad), lambda i: (0, 0)),     # S2 (resident)
            pl.BlockSpec((1, c_pad), lambda i: (0, 0)),         # b2 (f32)
        ],
        out_specs=pl.BlockSpec((tile_m, c_pad), lambda i: (i, 0)),
        compiler_params=cparams,
        cost_estimate=pl.CostEstimate(
            flops=2 * n_pad * n_pad * c_pad,
            transcendentals=n_pad * c_pad,
            bytes_accessed=2 * (n_pad * n_pad + n_pad * c_pad)
            + 4 * (c_pad + n_pad * c_pad),
        ),
    )(adj_p, s2, b2_p)

    # slice away row padding and the padded class columns
    return out_p[:n, :nclass]


def init_gcn_params(key, nfeat, nhid, nclass):
    """Matches GraphConvolution.reset_parameters: U(-stdv, stdv),
    stdv = 1/sqrt(out_features)."""
    k1, k2, k3, k4 = jax.random.split(key, 4)
    stdv1 = 1.0 / math.sqrt(nhid)
    stdv2 = 1.0 / math.sqrt(nclass)
    w1 = jax.random.uniform(k1, (nfeat, nhid), jnp.float32, -stdv1, stdv1)
    b1 = jax.random.uniform(k2, (1, nhid), jnp.float32, -stdv1, stdv1)
    w2 = jax.random.uniform(k3, (nhid, nclass), jnp.float32, -stdv2, stdv2)
    b2 = jax.random.uniform(k4, (1, nclass), jnp.float32, -stdv2, stdv2)
    return w1, b1, w2, b2


if __name__ == "__main__":
    # Small synthetic graph: N nodes, nfeat input features.
    N, NFEAT, NHID, NCLASS = 256, 64, 64, 8

    key = jax.random.PRNGKey(0)
    kx, kadj, kparams = jax.random.split(key, 3)

    x = jax.random.normal(kx, (N, NFEAT), jnp.float32)

    # Symmetric row-normalized adjacency with self-loops (typical GCN input).
    a = (jax.random.uniform(kadj, (N, N)) < 0.05).astype(jnp.float32)
    a = jnp.maximum(a, a.T) + jnp.eye(N, dtype=jnp.float32)
    adj = a / jnp.sum(a, axis=1, keepdims=True)

    w1, b1, w2, b2 = init_gcn_params(kparams, NFEAT, NHID, NCLASS)

    # Reference mirroring the kernel's mixed precision (bf16 matmuls, f32 acc).
    bf16 = jnp.bfloat16
    xb, adjb = x.astype(bf16), adj.astype(bf16)
    w1b, w2b = w1.astype(bf16), w2.astype(bf16)
    s1 = jnp.dot(xb, w1b, preferred_element_type=jnp.float32).astype(bf16)
    h1 = jnp.maximum(
        jnp.dot(adjb, s1, preferred_element_type=jnp.float32) + b1, 0.0
    ).astype(bf16)
    s2 = jnp.dot(h1, w2b, preferred_element_type=jnp.float32).astype(bf16)
    h2 = jnp.dot(adjb, s2, preferred_element_type=jnp.float32) + b2
    ref = jax.nn.log_softmax(h2, axis=-1)

    # 1) small-graph path: single fused pallas_call (default dispatch at N=256)
    out_single = gcn_forward(x, adj, w1, b1, w2, b2)
    jax.block_until_ready(out_single)

    # 2) tiled 3-call path (forced, so it is also exercised / validated here)
    out_tiled = gcn_forward(x, adj, w1, b1, w2, b2, tile_m=128, force_tiled=True)
    jax.block_until_ready(out_tiled)

    for out in (out_single, out_tiled):
        assert out.shape == (N, NCLASS)
        assert bool(jnp.all(jnp.isfinite(out)))
        err = float(jnp.max(jnp.abs(out - ref)))
        assert jnp.allclose(out, ref, atol=3e-2), f"mismatch vs reference: {err}"

    print("KERNEL_OK")
</pallas_src>

<mosaic_0001>
module attributes {stable_mosaic.version = 11 : i64} {
  func.func @_gcn_single_kernel(%arg0: memref<256x128xbf16, #tpu.memory_space<vmem>>, %arg1: memref<256x256xbf16, #tpu.memory_space<vmem>>, %arg2: memref<128x128xbf16, #tpu.memory_space<vmem>>, %arg3: memref<1x128xf32, #tpu.memory_space<vmem>>, %arg4: memref<128x128xbf16, #tpu.memory_space<vmem>>, %arg5: memref<1x128xf32, #tpu.memory_space<vmem>>, %arg6: memref<256x128xf32, #tpu.memory_space<vmem>>) attributes {dimension_semantics = [], scalar_prefetch = 0 : i64, scratch_operands = 0 : i64, tpu.core_type = #tpu.core_type<tc>} {
    %c0 = arith.constant 0 : index
    %c0_0 = arith.constant 0 : index
    %0 = vector.load %arg0[%c0, %c0_0] : memref<256x128xbf16, #tpu.memory_space<vmem>>, vector<256x128xbf16>
    %c0_1 = arith.constant 0 : index
    %c0_2 = arith.constant 0 : index
    %1 = vector.load %arg2[%c0_1, %c0_2] : memref<128x128xbf16, #tpu.memory_space<vmem>>, vector<128x128xbf16>
    %cst = arith.constant dense<0.000000e+00> : vector<256x128xf32>
    %2 = tpu.matmul %0, %1, %cst {dimension_numbers = #tpu.dot_dimension_numbers<[1], [0], [0], [1], [0, 0, 1, 1], [], []>} : vector<256x128xbf16>, vector<128x128xbf16>, vector<256x128xf32> -> vector<256x128xf32>
    %3 = arith.truncf %2 : vector<256x128xf32> to vector<256x128xbf16>
    %c0_3 = arith.constant 0 : index
    %c0_4 = arith.constant 0 : index
    %4 = vector.load %arg1[%c0_3, %c0_4] : memref<256x256xbf16, #tpu.memory_space<vmem>>, vector<256x256xbf16>
    %cst_5 = arith.constant dense<0.000000e+00> : vector<256x128xf32>
    %5 = tpu.matmul %4, %3, %cst_5 {dimension_numbers = #tpu.dot_dimension_numbers<[1], [0], [0], [1], [0, 0, 1, 1], [], []>} : vector<256x256xbf16>, vector<256x128xbf16>, vector<256x128xf32> -> vector<256x128xf32>
    %c0_6 = arith.constant 0 : index
    %c0_7 = arith.constant 0 : index
    %6 = vector.load %arg3[%c0_6, %c0_7] : memref<1x128xf32, #tpu.memory_space<vmem>>, vector<1x128xf32>
    %7 = vector.broadcast %6 : vector<1x128xf32> to vector<256x128xf32>
    %8 = arith.addf %5, %7 : vector<256x128xf32>
    %cst_8 = arith.constant 0.000000e+00 : f32
    %9 = vector.broadcast %cst_8 : f32 to vector<256x128xf32>
    %10 = arith.maximumf %8, %9 : vector<256x128xf32>
    %11 = arith.truncf %10 : vector<256x128xf32> to vector<256x128xbf16>
    %c0_9 = arith.constant 0 : index
    %c0_10 = arith.constant 0 : index
    %12 = vector.load %arg4[%c0_9, %c0_10] : memref<128x128xbf16, #tpu.memory_space<vmem>>, vector<128x128xbf16>
    %cst_11 = arith.constant dense<0.000000e+00> : vector<256x128xf32>
    %13 = tpu.matmul %11, %12, %cst_11 {dimension_numbers = #tpu.dot_dimension_numbers<[1], [0], [0], [1], [0, 0, 1, 1], [], []>} : vector<256x128xbf16>, vector<128x128xbf16>, vector<256x128xf32> -> vector<256x128xf32>
    %14 = arith.truncf %13 : vector<256x128xf32> to vector<256x128xbf16>
    %c0_12 = arith.constant 0 : index
    %c0_13 = arith.constant 0 : index
    %15 = vector.load %arg1[%c0_12, %c0_13] : memref<256x256xbf16, #tpu.memory_space<vmem>>, vector<256x256xbf16>
    %cst_14 = arith.constant dense<0.000000e+00> : vector<256x128xf32>
    %16 = tpu.matmul %15, %14, %cst_14 {dimension_numbers = #tpu.dot_dimension_numbers<[1], [0], [0], [1], [0, 0, 1, 1], [], []>} : vector<256x256xbf16>, vector<256x128xbf16>, vector<256x128xf32> -> vector<256x128xf32>
    %c0_15 = arith.constant 0 : index
    %c0_16 = arith.constant 0 : index
    %17 = vector.load %arg5[%c0_15, %c0_16] : memref<1x128xf32, #tpu.memory_space<vmem>>, vector<1x128xf32>
    %18 = vector.broadcast %17 : vector<1x128xf32> to vector<256x128xf32>
    %19 = arith.addf %16, %18 : vector<256x128xf32>
    %cst_17 = arith.constant dense<0xFF800000> : vector<256xf32>
    %20 = vector.multi_reduction <maximumf>, %19, %cst_17 [1] : vector<256x128xf32> to vector<256xf32>
    %21 = vector.shape_cast %20 : vector<256xf32> to vector<256x1xf32>
    %22 = vector.broadcast %21 : vector<256x1xf32> to vector<256x128xf32>
    %23 = arith.subf %19, %22 : vector<256x128xf32>
    %24 = math.exp %23 : vector<256x128xf32>
    %cst_18 = arith.constant dense<0.000000e+00> : vector<256xf32>
    %25 = vector.multi_reduction <add>, %24, %cst_18 [1] : vector<256x128xf32> to vector<256xf32>
    %26 = vector.shape_cast %25 : vector<256xf32> to vector<256x1xf32>
    %27 = math.log %26 : vector<256x1xf32>
    %28 = vector.broadcast %27 : vector<256x1xf32> to vector<256x128xf32>
    %29 = arith.subf %23, %28 : vector<256x128xf32>
    %c0_19 = arith.constant 0 : index
    %c0_20 = arith.constant 0 : index
    %30 = vector.load %arg6[%c0_19, %c0_20] : memref<256x128xf32, #tpu.memory_space<vmem>>, vector<256x128xf32>
    tpu.vector_store %arg6[%c0_19, %c0_20], %29 {strides = array<i32>} : memref<256x128xf32, #tpu.memory_space<vmem>>, vector<256x128xf32>,
    return
  }
}

</mosaic_0001>

<bundles_post_ra>
// kernel: tpu_custom_call.1
= control target key start
LH: loop header
LB: loop body
LE: loop exit
PB: predicated region body
PF: predicated region fallthrough
CT: control target
= control target key end

     0   :  { %11 = vsyncpa [#allocation3], 0  ;;  %s2990_s0 = inlined_call_operand.hbm [shape: bf16[256,128], index: 0, kind: input, shape index: {}]   ;;  %s2991_s1 = inlined_call_operand.hbm [shape: bf16[256,256], index: 1, kind: input, shape index: {}]   ;;  %s2992_s2 = inlined_call_operand.hbm [shape: bf16[128,128], index: 2, kind: input, shape index: {}]   ;;  %s2993_s3 = inlined_call_operand.vmem [shape: f32[1,128], index: 3, kind: input, shape index: {}]   ;;  %s2994_s4 = inlined_call_operand.hbm [shape: bf16[128,128], index: 4, kind: input, shape index: {}]   ;;  %s2995_s5 = inlined_call_operand.vmem [shape: f32[1,128], index: 5, kind: input, shape index: {}]   ;;  %s2996_s6 = inlined_call_operand.hbm [shape: f32[256,128], index: 6, kind: output, shape index: {}]  }
   0x1   :  { %12 = vsyncpa [#allocation6], 0 }
   0x2   :  { %13 = vsyncpa [#allocation9], 0 }
   0x3   :  { %14 = vsyncpa [#allocation4], 0  ;;  %s2406_s21 = smov [#allocation5]   ;;  %s2288_s25 = scalar_lea.hbm %s2991_s1, 4096 }
   0x4   :  { %s32_s22 = sshll.u32 %s2406_s21, 4  ;;  %p2289_p0 = scmp.ne.s32.totalorder %s2991_s1, %s2288_s25  ;;  %s33_s22 = int_to_ptr.vmem [resolvable:$true] %s32_s22 }
   0x5   :  { %p2292_p1 = scmp.lt.u32.totalorder %s2288_s25, %s2991_s1 }
   0x7   :  { %p2294_p2 = pnand %p2292_p1, %p2289_p0 }
   0x9   :  { %2297 = shalt.err (!%p2294_p2)
}
   0xa   :  { %s2298_s30 = scalar_lea.vmem %s33_s22, 4096  ;;  %p2303_p4 = scmp.lt.s32.totalorder %s33_s22, %s33_s22 }
   0xb   :  { %p2299_p3 = scmp.ne.s32.totalorder %s33_s22, %s2298_s30  ;;  %p2304_p5 = scmp.lt.s32.totalorder %s2298_s30, %s2298_s30 }
   0xd   :  { %p2305_p6 = por %p2304_p5, %p2303_p4 }
   0xf   :  { %p2306_p7 = pnand %p2305_p6, %p2299_p3 }
  0x11   :  { %2309 = shalt.err (!%p2306_p7)
}
  0x12   :  { %s2407_s7 = smov 128   ;;  %s2408_s8 = smov 8  }
  0x13   :  { %38 = dma.hbm_to_vmem [thread:$0]  %s2991_s1, 4096, %s33_s22, [#allocation6], %s2407_s7, %s2407_s7, %s2408_s8  }
  0x14   :  { %s2409_s11 = smov [#allocation2]   ;;  %s2310_s15 = scalar_lea.hbm %s2990_s0, 2048 }
  0x15   :  { %s20_s12 = sshll.u32 %s2409_s11, 4  ;;  %p2311_p8 = scmp.ne.s32.totalorder %s2990_s0, %s2310_s15  ;;  %s21_s12 = int_to_ptr.vmem [resolvable:$true] %s20_s12 }
  0x16   :  { %p2314_p9 = scmp.lt.u32.totalorder %s2310_s15, %s2990_s0 }
  0x18   :  { %p2316_p10 = pnand %p2314_p9, %p2311_p8 }
  0x1a   :  { %2319 = shalt.err (!%p2316_p10)
}
  0x1b   :  { %s2320_s20 = scalar_lea.vmem %s21_s12, 2048  ;;  %p2325_p12 = scmp.lt.s32.totalorder %s21_s12, %s21_s12 }
  0x1c   :  { %p2321_p11 = scmp.ne.s32.totalorder %s21_s12, %s2320_s20  ;;  %p2326_p13 = scmp.lt.s32.totalorder %s2320_s20, %s2320_s20 }
  0x1e   :  { %p2327_p0 = por %p2326_p13, %p2325_p12 }
  0x20   :  { %p2328_p1 = pnand %p2327_p0, %p2321_p11 }
  0x22   :  { %2331 = shalt.err (!%p2328_p1)
}
  0x23   :  { %s2410_s1 = smov 64   ;;  %s2411_s21 = smov 4  }
  0x24   :  { %26 = dma.hbm_to_vmem [thread:$0]  %s2990_s0, 2048, %s21_s12, [#allocation3], %s2410_s1, %s2410_s1, %s2411_s21  }
  0x25   :  { %s2412_s24 = smov [#allocation7]   ;;  %s2413_s26 = smov [#allocation8]  }
  0x26   :  { %s44_s25 = sshll.u32 %s2412_s24, 4  ;;  %s58_s27 = sshll.u32 %s2413_s26, 4  ;;  %s45_s25 = int_to_ptr.vmem [resolvable:$true] %s44_s25  ;;  %s2480_s27 = int_to_ptr.vmem [resolvable:$true] %s58_s27 }
  0x27   :  { %s2332_s30 = scalar_lea.hbm %s2992_s2, 1024 }
  0x28   :  { %p2333_p2 = scmp.ne.s32.totalorder %s2992_s2, %s2332_s30  ;;  %p2336_p3 = scmp.lt.u32.totalorder %s2332_s30, %s2992_s2 }
  0x2a   :  { %p2338_p4 = pnand %p2336_p3, %p2333_p2 }
  0x2c   :  { %2341 = shalt.err (!%p2338_p4)
}
  0x2d   :  { %s2342_s0 = scalar_lea.vmem %s45_s25, 1024  ;;  %p2347_p6 = scmp.lt.s32.totalorder %s45_s25, %s45_s25 }
  0x2e   :  { %p2343_p5 = scmp.ne.s32.totalorder %s45_s25, %s2342_s0  ;;  %p2348_p7 = scmp.lt.s32.totalorder %s2342_s0, %s2342_s0 }
  0x30   :  { %p2349_p8 = por %p2348_p7, %p2347_p6 }
  0x32   :  { %p2350_p9 = pnand %p2349_p8, %p2343_p5 }
  0x34   :  { %2353 = shalt.err (!%p2350_p9)
}
  0x35   :  { %50 = dma.hbm_to_vmem [thread:$0]  %s2992_s2, 1024, %s45_s25, [#allocation6], %s2410_s1, %s2410_s1, %s2411_s21  }
  0x36   :  { %s2354_s17 = scalar_lea.hbm %s2994_s4, 1024 }
  0x37   :  { %p2355_p10 = scmp.ne.s32.totalorder %s2994_s4, %s2354_s17  ;;  %p2358_p11 = scmp.lt.u32.totalorder %s2354_s17, %s2994_s4 }
  0x39   :  { %p2360_p12 = pnand %p2358_p11, %p2355_p10 }
  0x3b   :  { %2363 = shalt.err (!%p2360_p12)
}
  0x3c   :  { %s2364_s23 = scalar_lea.vmem %s2480_s27, 1024  ;;  %p2369_p0 = scmp.lt.s32.totalorder %s2480_s27, %s2480_s27 }
  0x3d   :  { %p2365_p13 = scmp.ne.s32.totalorder %s2480_s27, %s2364_s23  ;;  %p2370_p1 = scmp.lt.s32.totalorder %s2364_s23, %s2364_s23 }
  0x3f   :  { %p2371_p2 = por %p2370_p1, %p2369_p0 }
  0x41   :  { %p2372_p3 = pnand %p2371_p2, %p2365_p13 }
  0x43   :  { %2375 = shalt.err (!%p2372_p3)
}
  0x44   :  { %64 = dma.hbm_to_vmem [thread:$0]  %s2994_s4, 1024, %s2480_s27, [#allocation9], %s2410_s1, %s2410_s1, %s2411_s21  }
  0x45   :  { %2398 = dma.done.wait [#allocation3], 2048  }
  0x46   :  { %2399 = vsyncadd [#allocation3], 4294965248 }
  0x47   :  { %2400 = dma.done.wait [#allocation6], 5120  }
  0x48   :  { %2401 = vsyncadd [#allocation6], 4294962176 }
  0x49   :  { %2402 = dma.done.wait [#allocation9], 1024  }
  0x4a   :  { %2403 = vsyncadd [#allocation9], 4294966272  ;;  %v2080_v0 = vld [vmem:[#allocation7] sm:$0xff]   ;;  %v2081_v1 = vld [vmem:[#allocation7 + $0x8] sm:$0xff]  }
  0x4b   :  { %1975 = vmatprep.subr.bf16.mxu1 %v2080_v0  ;;  %v2082_v2 = vld [vmem:[#allocation7 + $0x10] sm:$0xff]   ;;  %v2083_v3 = vld [vmem:[#allocation7 + $0x18] sm:$0xff]   ;;  %v2088_v4 = vld [vmem:[#allocation2] sm:$0xff]  }
  0x4c   :  { %1976 = vmatpush3.bf16.msra.mxu1 %v2080_v0  ;;  %1991 = vmatprep.mubr.bf16.mxu1 %v2088_v4  ;;  %v2084_v5 = vld [vmem:[#allocation7 + $0x20] sm:$0xff]   ;;  %v2085_v6 = vld [vmem:[#allocation7 + $0x28] sm:$0xff]   ;;  %v2086_v7 = vld [vmem:[#allocation7 + $0x30] sm:$0xff]  }
  0x4d   :  { %1977 = vmatprep.subr.bf16.mxu1 %v2081_v1  ;;  %v2087_v8 = vld [vmem:[#allocation7 + $0x38] sm:$0xff]   ;;  %v2089_v9 = vld [vmem:[#allocation2 + $0x8] sm:$0xff]   ;;  %v2090_v10 = vld [vmem:[#allocation2 + $0x10] sm:$0xff]  }
  0x4e   :  { %v2091_v11 = vld [vmem:[#allocation2 + $0x18] sm:$0xff]   ;;  %v2092_v12 = vld [vmem:[#allocation2 + $0x20] sm:$0xff]   ;;  %v2093_v13 = vld [vmem:[#allocation2 + $0x28] sm:$0xff]  }
  0x4f   :  { %v2094_v14 = vld [vmem:[#allocation2 + $0x30] sm:$0xff]   ;;  %v2095_v15 = vld [vmem:[#allocation2 + $0x38] sm:$0xff]   ;;  %v2096_v16 = vld [vmem:[#allocation2 + $0x40] sm:$0xff]  }
  0x50   :  { %1978 = vmatpush3.bf16.msra.mxu1 %v2081_v1  ;;  %v2097_v17 = vld [vmem:[#allocation2 + $0x48] sm:$0xff]   ;;  %v2098_v18 = vld [vmem:[#allocation2 + $0x50] sm:$0xff]   ;;  %v2099_v19 = vld [vmem:[#allocation2 + $0x58] sm:$0xff]  }
  0x51   :  { %1979 = vmatprep.subr.bf16.mxu1 %v2082_v2  ;;  %v2100_v20 = vld [vmem:[#allocation2 + $0x60] sm:$0xff]   ;;  %v2101_v21 = vld [vmem:[#allocation2 + $0x68] sm:$0xff]   ;;  %v2102_v22 = vld [vmem:[#allocation2 + $0x70] sm:$0xff]  }
  0x52   :  { %v2103_v23 = vld [vmem:[#allocation2 + $0x78] sm:$0xff]   ;;  %v2517_v24 = vld [vmem:[#allocation5 + $0x4] ss:$8 sps:$4 sm:$0xff]  }
  0x54   :  { %1980 = vmatpush3.bf16.msra.mxu1 %v2082_v2 }
  0x55   :  { %1981 = vmatprep.subr.bf16.mxu1 %v2083_v3 }
  0x58   :  { %1982 = vmatpush3.bf16.msra.mxu1 %v2083_v3 }
  0x59   :  { %1983 = vmatprep.subr.bf16.mxu1 %v2084_v5 }
  0x5c   :  { %1984 = vmatpush3.bf16.msra.mxu1 %v2084_v5 }
  0x5d   :  { %1985 = vmatprep.subr.bf16.mxu1 %v2085_v6 }
  0x60   :  { %1986 = vmatpush3.bf16.msra.mxu1 %v2085_v6 }
  0x61   :  { %1987 = vmatprep.subr.bf16.mxu1 %v2086_v7 }
  0x64   :  { %1988 = vmatpush3.bf16.msra.mxu1 %v2086_v7 }
  0x65   :  { %1989 = vmatprep.subr.bf16.mxu1 %v2087_v8 }
  0x68   :  { %1990 = vmatpush3.bf16.msra.mxu1 %v2087_v8 }
  0x6b   :  { %1992 = vmatmul.mubr.bf16.vlgmr.msra.gmra.mrb[0].mxu1 %v2089_v9  ;;  %v2152_v9 = vld [vmem:[#allocation8] sm:$0xff]  }
  0x6c   :  { %1995 = vmatprep.mubr.bf16.mxu1 %v2090_v10  ;;  %v2153_v10 = vld [vmem:[#allocation8 + $0x8] sm:$0xff]   ;;  %2023 = vmatprep.subr.bf16.mxu0 %v2152_v9 }
  0x6d   :  { %2024 = vmatpush3.bf16.msra.mxu0 %v2152_v9 }
  0x6e   :  { %2025 = vmatprep.subr.bf16.mxu0 %v2153_v10 }
  0x71   :  { %2026 = vmatpush3.bf16.msra.mxu0 %v2153_v10 }
  0x73   :  { %1996 = vmatmul.mubr.bf16.gmra.mrb[4].mxu1 %v2091_v11  ;;  %v2520_v11 = vld [vmem:[#allocation5] ss:$8 sps:$4 sm:$0xff]  }
  0x74   :  { %1999 = vmatprep.mubr.bf16.mxu1 %v2092_v12  ;;  %v2154_v12 = vld [vmem:[#allocation8 + $0x10] sm:$0xff]  }
  0x75   :  { %2027 = vmatprep.subr.bf16.mxu0 %v2154_v12 }
  0x76   :  { %2028 = vmatpush3.bf16.msra.mxu0 %v2154_v12 }
  0x7b   :  { %2000 = vmatmul.mubr.bf16.gmra.mrb[8].mxu1 %v2093_v13  ;;  %v2522_v13 = vld [vmem:[#allocation5 + $0x14] ss:$8 sps:$4 sm:$0xff]  }
  0x7c   :  { %2003 = vmatprep.mubr.bf16.mxu1 %v2094_v14  ;;  %v2155_v14 = vld [vmem:[#allocation8 + $0x18] sm:$0xff]  }
  0x7d   :  { %2029 = vmatprep.subr.bf16.mxu0 %v2155_v14 }
  0x7e   :  { %2030 = vmatpush3.bf16.msra.mxu0 %v2155_v14 }
  0x83   :  { %2004 = vmatmul.mubr.bf16.gmra.mrb[12].mxu1 %v2095_v15  ;;  %v2526_v15 = vld [vmem:[#allocation5 + $0x10] ss:$8 sps:$4 sm:$0xff]  }
  0x84   :  { %2007 = vmatprep.mubr.bf16.mxu1 %v2096_v16  ;;  %v2528_v16 = vld [vmem:[#allocation5 + $0x24] ss:$8 sps:$4 sm:$0xff]  }
  0x8b   :  { %2008 = vmatmul.mubr.bf16.gmra.mrb[16].mxu1 %v2097_v17  ;;  %v2532_v17 = vld [vmem:[#allocation5 + $0x20] ss:$8 sps:$4 sm:$0xff]  }
  0x8c   :  { %2011 = vmatprep.mubr.bf16.mxu1 %v2098_v18  ;;  %v2534_v18 = vld [vmem:[#allocation5 + $0x34] ss:$8 sps:$4 sm:$0xff]  }
  0x93   :  { %2012 = vmatmul.mubr.bf16.gmra.mrb[20].mxu1 %v2099_v19  ;;  %v2538_v19 = vld [vmem:[#allocation5 + $0x30] ss:$8 sps:$4 sm:$0xff]  }
  0x94   :  { %2015 = vmatprep.mubr.bf16.mxu1 %v2100_v20  ;;  %v2540_v20 = vld [vmem:[#allocation5 + $0x44] ss:$8 sps:$4 sm:$0xff]  }
  0x9b   :  { %2016 = vmatmul.mubr.bf16.gmra.mrb[24].mxu1 %v2101_v21  ;;  %v2544_v21 = vld [vmem:[#allocation5 + $0x40] ss:$8 sps:$4 sm:$0xff]  }
  0x9c   :  { %2019 = vmatprep.mubr.bf16.mxu1 %v2102_v22  ;;  %v2546_v22 = vld [vmem:[#allocation5 + $0x54] ss:$8 sps:$4 sm:$0xff]  }
  0xa3   :  { %2020 = vmatmul.mubr.bf16.gmra.mrb[28].mxu1 %v2103_v23  ;;  %v2550_v23 = vld [vmem:[#allocation5 + $0x50] ss:$8 sps:$4 sm:$0xff]  }
  0xa4   :  { %680 = vmatprep.mubr.bf16.mxu1 %v2517_v24 }
 0x13e   :  { %v1993_v25 = vpop.f32.mrb[0].mxu1 }
 0x13f   :  { %v306_v26 = vpop.f32.mrb[1].mxu1 }
 0x140   :  { %v1994_v27 = vpop.f32.mrb[2].mxu1 }
 0x141   :  { %v434_v28 = vpack.c.bf16 %v1994_v27, %v1993_v25  ;;  %v309_v29 = vpop.f32.mrb[3].mxu1  ;;  %v2552_v25 = vld [vmem:[#allocation5 + $0x64] ss:$8 sps:$4 sm:$0xff]   ;;  %v2558_v27 = vld [vmem:[#allocation5 + $0x74] ss:$8 sps:$4 sm:$0xff]  }
 0x142   :  { %v433_v30 = vpack.c.bf16 %v309_v29, %v306_v26  ;;  %v2556_v26 = vld [vmem:[#allocation5 + $0x60] ss:$8 sps:$4 sm:$0xff]   ;;  %v2564_v29 = vld [vmem:[#allocation5 + $0x84] ss:$8 sps:$4 sm:$0xff]  }
 0x146   :  { %v1997_v31 = vpop.f32.mrb[4].mxu1 }
 0x147   :  { %v322_v32 = vpop.f32.mrb[5].mxu1 }
 0x148   :  { %v1998_v33 = vpop.f32.mrb[6].mxu1 }
 0x149   :  { %v436_v34 = vpack.c.bf16 %v1998_v33, %v1997_v31  ;;  %v325_v35 = vpop.f32.mrb[7].mxu1  ;;  %v2570_v31 = vld [vmem:[#allocation5 + $0x94] ss:$8 sps:$4 sm:$0xff]   ;;  %v2576_v33 = vld [vmem:[#allocation5 + $0xa4] ss:$8 sps:$4 sm:$0xff]  }
 0x14a   :  { %v435_v36 = vpack.c.bf16 %v325_v35, %v322_v32  ;;  %v2574_v32 = vld [vmem:[#allocation5 + $0x90] ss:$8 sps:$4 sm:$0xff]   ;;  %v2582_v35 = vld [vmem:[#allocation5 + $0xb4] ss:$8 sps:$4 sm:$0xff]  }
 0x14e   :  { %v2001_v37 = vpop.f32.mrb[8].mxu1 }
 0x14f   :  { %v338_v38 = vpop.f32.mrb[9].mxu1 }
 0x150   :  { %v2002_v39 = vpop.f32.mrb[10].mxu1 }
 0x151   :  { %v438_v40 = vpack.c.bf16 %v2002_v39, %v2001_v37  ;;  %v341_v41 = vpop.f32.mrb[11].mxu1  ;;  %v2588_v37 = vld [vmem:[#allocation5 + $0xc4] ss:$8 sps:$4 sm:$0xff]  }
 0x152   :  { %v437_v42 = vpack.c.bf16 %v341_v41, %v338_v38  ;;  %v2156_v38 = vld [vmem:[#allocation8 + $0x20] sm:$0xff]   ;;  %v2157_v39 = vld [vmem:[#allocation8 + $0x28] sm:$0xff]   ;;  %v2594_v41 = vld [vmem:[#allocation5 + $0xd4] ss:$8 sps:$4 sm:$0xff]  }
 0x153   :  { %2031 = vmatprep.subr.bf16.mxu0 %v2156_v38 }
 0x154   :  { %2032 = vmatpush3.bf16.msra.mxu0 %v2156_v38 }
 0x155   :  { %2033 = vmatprep.subr.bf16.mxu0 %v2157_v39 }
 0x156   :  { %v2005_v43 = vpop.f32.mrb[12].mxu1 }
 0x157   :  { %v354_v44 = vpop.f32.mrb[13].mxu1 }
 0x158   :  { %v2006_v45 = vpop.f32.mrb[14].mxu1  ;;  %2034 = vmatpush3.bf16.msra.mxu0 %v2157_v39 }
 0x159   :  { %v440_v46 = vpack.c.bf16 %v2006_v45, %v2005_v43  ;;  %v357_v47 = vpop.f32.mrb[15].mxu1  ;;  %v2159_v43 = vld [vmem:[#allocation8 + $0x38] sm:$0xff]   ;;  %v2600_v45 = vld [vmem:[#allocation5 + $0xe4] ss:$8 sps:$4 sm:$0xff]  }
 0x15a   :  { %v439_v48 = vpack.c.bf16 %v357_v47, %v354_v44  ;;  %v2598_v44 = vld [vmem:[#allocation5 + $0xd0] ss:$8 sps:$4 sm:$0xff]   ;;  %v2606_v47 = vld [vmem:[#allocation5 + $0xf4] ss:$8 sps:$4 sm:$0xff]  }
 0x15e   :  { %v2009_v49 = vpop.f32.mrb[16].mxu1 }
 0x15f   :  { %v370_v50 = vpop.f32.mrb[17].mxu1 }
 0x160   :  { %v2010_v51 = vpop.f32.mrb[18].mxu1 }
 0x161   :  { %v442_v52 = vpack.c.bf16 %v2010_v51, %v2009_v49  ;;  %v373_v53 = vpop.f32.mrb[19].mxu1  ;;  %v2616_v51 = vld [vmem:[%s2993_s3] ss:$0 sm:$0xff] }
 0x162   :  { %v441_v54 = vpack.c.bf16 %v373_v53, %v370_v50 }
 0x164   :  { %1727 = vmatprep.subr.bf16.mxu1 %v441_v54 }
 0x165   :  { %1728 = vmatpush3.bf16.msra.mxu1 %v433_v30  ;;  %v2568_v30 = vld [vmem:[#allocation5 + $0x80] ss:$8 sps:$4 sm:$0xff]  }
 0x166   :  { %v2013_v55 = vpop.f32.mrb[20].mxu1  ;;  %1729 = vmatprep.subr.bf16.mxu1 %v442_v52 }
 0x167   :  { %v386_v56 = vpop.f32.mrb[21].mxu1 }
 0x168   :  { %v2014_v57 = vpop.f32.mrb[22].mxu1 }
 0x169   :  { %v444_v58 = vpack.c.bf16 %v2014_v57, %v2013_v55  ;;  %v389_v59 = vpop.f32.mrb[23].mxu1  ;;  %1730 = vmatpush3.bf16.msra.mxu1 %v434_v28  ;;  %v2562_v28 = vld [vmem:[#allocation5 + $0x70] ss:$8 sps:$4 sm:$0xff]  }
 0x16a   :  { %v443_v60 = vpack.c.bf16 %v389_v59, %v386_v56 }
 0x16c   :  { %1731 = vmatprep.subr.bf16.mxu1 %v443_v60 }
 0x16d   :  { %1732 = vmatpush3.bf16.msra.mxu1 %v435_v36  ;;  %v2586_v36 = vld [vmem:[#allocation5 + $0xb0] ss:$8 sps:$4 sm:$0xff]  }
 0x16e   :  { %v2017_v61 = vpop.f32.mrb[24].mxu1  ;;  %1733 = vmatprep.subr.bf16.mxu1 %v444_v58 }
 0x16f   :  { %v402_v62 = vpop.f32.mrb[25].mxu1 }
 0x170   :  { %v2018_v63 = vpop.f32.mrb[26].mxu1 }
 0x171   :  { %v446_v0 = vpack.c.bf16 %v2018_v63, %v2017_v61  ;;  %v405_v1 = vpop.f32.mrb[27].mxu1  ;;  %1734 = vmatpush3.bf16.msra.mxu1 %v436_v34  ;;  %v2580_v34 = vld [vmem:[#allocation5 + $0xa0] ss:$8 sps:$4 sm:$0xff]  }
 0x172   :  { %v445_v2 = vpack.c.bf16 %v405_v1, %v402_v62 }
 0x174   :  { %1735 = vmatprep.subr.bf16.mxu1 %v445_v2 }
 0x175   :  { %1736 = vmatpush3.bf16.msra.mxu1 %v437_v42  ;;  %v2158_v42 = vld [vmem:[#allocation8 + $0x30] sm:$0xff]  }
 0x176   :  { %v2021_v3 = vpop.f32.mrb[28].mxu1  ;;  %1737 = vmatprep.subr.bf16.mxu1 %v446_v0  ;;  %2035 = vmatprep.subr.bf16.mxu0 %v2158_v42 }
 0x177   :  { %v418_v4 = vpop.f32.mrb[29].mxu1  ;;  %2036 = vmatpush3.bf16.msra.mxu0 %v2158_v42 }
 0x178   :  { %v2022_v5 = vpop.f32.mrb[30].mxu1  ;;  %2037 = vmatprep.subr.bf16.mxu0 %v2159_v43 }
 0x179   :  { %v448_v6 = vpack.c.bf16 %v2022_v5, %v2021_v3  ;;  %v421_v7 = vpop.f32.mrb[31].mxu1  ;;  %1738 = vmatpush3.bf16.msra.mxu1 %v438_v40  ;;  %v2592_v40 = vld [vmem:[#allocation5 + $0xc0] ss:$8 sps:$4 sm:$0xff]  }
 0x17a   :  { %v447_v8 = vpack.c.bf16 %v421_v7, %v418_v4 }
 0x17b   :  { %2038 = vmatpush3.bf16.msra.mxu0 %v2159_v43 }
 0x17c   :  { %1739 = vmatprep.subr.bf16.mxu1 %v447_v8 }
 0x17d   :  { %1740 = vmatpush3.bf16.msra.mxu1 %v439_v48  ;;  %v2610_v48 = vld [vmem:[#allocation5 + $0xf0] ss:$8 sps:$4 sm:$0xff]  }
 0x17e   :  { %1741 = vmatprep.subr.bf16.mxu1 %v448_v6 }
 0x181   :  { %1742 = vmatpush3.bf16.msra.mxu1 %v440_v46  ;;  %v2604_v46 = vld [vmem:[#allocation5 + $0xe0] ss:$8 sps:$4 sm:$0xff]  }
 0x184   :  { %681 = vmatmul.mubr.bf16.vlgmr.msra.gmra.mrb[32].mxu1 %v2520_v11 }
 0x185   :  { %688 = vmatprep.mubr.bf16.mxu1 %v2522_v13 }
 0x18c   :  { %689 = vmatmul.mubr.bf16.gmra.mrb[36].mxu1 %v2526_v15 }
 0x18d   :  { %696 = vmatprep.mubr.bf16.mxu1 %v2528_v16 }
 0x194   :  { %697 = vmatmul.mubr.bf16.gmra.mrb[40].mxu1 %v2532_v17 }
 0x195   :  { %704 = vmatprep.mubr.bf16.mxu1 %v2534_v18 }
 0x19c   :  { %705 = vmatmul.mubr.bf16.gmra.mrb[44].mxu1 %v2538_v19 }
 0x19d   :  { %712 = vmatprep.mubr.bf16.mxu1 %v2540_v20 }
 0x1a4   :  { %713 = vmatmul.mubr.bf16.gmra.mrb[48].mxu1 %v2544_v21 }
 0x1a5   :  { %720 = vmatprep.mubr.bf16.mxu1 %v2546_v22 }
 0x1ac   :  { %721 = vmatmul.mubr.bf16.gmra.mrb[52].mxu1 %v2550_v23 }
 0x1ad   :  { %728 = vmatprep.mubr.bf16.mxu1 %v2552_v25 }
 0x1b4   :  { %729 = vmatmul.mubr.bf16.gmra.mrb[56].mxu1 %v2556_v26 }
 0x1b5   :  { %736 = vmatprep.mubr.bf16.mxu1 %v2558_v27 }
 0x1bc   :  { %737 = vmatmul.mubr.bf16.gmra.mrb[60].mxu1 %v2562_v28 }
 0x1bd   :  { %744 = vmatprep.mubr.bf16.mxu1 %v2564_v29 }
 0x1c4   :  { %745 = vmatmul.mubr.bf16.gmra.mrb[64].mxu1 %v2568_v30 }
 0x1c5   :  { %752 = vmatprep.mubr.bf16.mxu1 %v2570_v31 }
 0x1cc   :  { %753 = vmatmul.mubr.bf16.gmra.mrb[68].mxu1 %v2574_v32 }
 0x1cd   :  { %760 = vmatprep.mubr.bf16.mxu1 %v2576_v33 }
 0x1d4   :  { %761 = vmatmul.mubr.bf16.gmra.mrb[72].mxu1 %v2580_v34 }
 0x1d5   :  { %768 = vmatprep.mubr.bf16.mxu1 %v2582_v35 }
 0x1dc   :  { %769 = vmatmul.mubr.bf16.gmra.mrb[76].mxu1 %v2586_v36 }
 0x1dd   :  { %776 = vmatprep.mubr.bf16.mxu1 %v2588_v37 }
 0x1e4   :  { %777 = vmatmul.mubr.bf16.gmra.mrb[80].mxu1 %v2592_v40 }
 0x1e5   :  { %784 = vmatprep.mubr.bf16.mxu1 %v2594_v41 }
 0x1ec   :  { %785 = vmatmul.mubr.bf16.gmra.mrb[84].mxu1 %v2598_v44 }
 0x1ed   :  { %792 = vmatprep.mubr.bf16.mxu1 %v2600_v45 }
 0x1f4   :  { %793 = vmatmul.mubr.bf16.gmra.mrb[88].mxu1 %v2604_v46 }
 0x1f5   :  { %800 = vmatprep.mubr.bf16.mxu1 %v2606_v47 }
 0x1fc   :  { %801 = vmatmul.mubr.bf16.gmra.mrb[92].mxu1 %v2610_v48 }
 0x257   :  { %v1743_v49 = vpop.f32.mrb[32].mxu1 }
 0x258   :  { %v1744_v50 = vpop.f32.mrb[33].mxu1 }
 0x259   :  { %v1745_v52 = vadd.f32 %v1744_v50, %v1743_v49  ;;  %v1746_v53 = vpop.f32.mrb[34].mxu1 }
 0x25a   :  { %v1747_v54 = vpop.f32.mrb[35].mxu1 }
 0x25b   :  { %v1748_v55 = vadd.f32 %v1747_v54, %v1746_v53  ;;  %v683_v56 = vadd.f32 %v1745_v52, %v2616_v51 }
 0x25d   :  { %v686_v57 = vadd.f32 %v1748_v55, %v2616_v51  ;;  %v809_v59 = vmax.f32 %v683_v56, 0.0 }
 0x25f   :  { %v1749_v58 = vpop.f32.mrb[36].mxu1  ;;  %v810_v60 = vmax.f32 %v686_v57, 0.0 }
 0x260   :  { %v1750_v61 = vpop.f32.mrb[37].mxu1 }
 0x261   :  { %v1751_v62 = vadd.f32 %v1750_v61, %v1749_v58  ;;  %v1752_v63 = vpop.f32.mrb[38].mxu1  ;;  %v841_v0 = vpack.c.bf16 %v810_v60, %v809_v59 }
 0x262   :  { %v1753_v1 = vpop.f32.mrb[39].mxu1 }
 0x263   :  { %v691_v2 = vadd.f32 %v1751_v62, %v2616_v51  ;;  %v1754_v3 = vadd.f32 %v1753_v1, %v1752_v63  ;;  %2039 = vmatprep.mubr.bf16.mxu0 %v841_v0 }
 0x265   :  { %v694_v4 = vadd.f32 %v1754_v3, %v2616_v51  ;;  %v811_v5 = vmax.f32 %v691_v2, 0.0 }
 0x267   :  { %v812_v6 = vmax.f32 %v694_v4, 0.0  ;;  %v1755_v7 = vpop.f32.mrb[40].mxu1 }
 0x268   :  { %v1756_v8 = vpop.f32.mrb[41].mxu1 }
 0x269   :  { %v1757_v9 = vadd.f32 %v1756_v8, %v1755_v7  ;;  %v842_v10 = vpack.c.bf16 %v812_v6, %v811_v5  ;;  %v1758_v12 = vpop.f32.mrb[42].mxu1 }
 0x26a   :  { %v1759_v14 = vpop.f32.mrb[43].mxu1 }
 0x26b   :  { %v699_v38 = vadd.f32 %v1757_v9, %v2616_v51  ;;  %2040 = vmatmul.mubr.bf16.vlgmr.msra.gmra.mrb[0].mxu0 %v842_v10  ;;  %v1760_v39 = vadd.f32 %v1759_v14, %v1758_v12 }
 0x26d   :  { %v702_v42 = vadd.f32 %v1760_v39, %v2616_v51  ;;  %v813_v43 = vmax.f32 %v699_v38, 0.0 }
 0x26f   :  { %v814_v49 = vmax.f32 %v702_v42, 0.0  ;;  %v1761_v50 = vpop.f32.mrb[44].mxu1 }
 0x270   :  { %v1762_v52 = vpop.f32.mrb[45].mxu1 }
 0x271   :  { %v1763_v53 = vadd.f32 %v1762_v52, %v1761_v50  ;;  %v1764_v54 = vpop.f32.mrb[46].mxu1  ;;  %v843_v55 = vpack.c.bf16 %v814_v49, %v813_v43 }
 0x272   :  { %v1765_v56 = vpop.f32.mrb[47].mxu1 }
 0x273   :  { %v707_v57 = vadd.f32 %v1763_v53, %v2616_v51  ;;  %v1766_v58 = vadd.f32 %v1765_v56, %v1764_v54  ;;  %2043 = vmatprep.mubr.bf16.mxu0 %v843_v55 }
 0x275   :  { %v710_v59 = vadd.f32 %v1766_v58, %v2616_v51  ;;  %v815_v60 = vmax.f32 %v707_v57, 0.0 }
 0x277   :  { %v816_v61 = vmax.f32 %v710_v59, 0.0  ;;  %v1767_v62 = vpop.f32.mrb[48].mxu1 }
 0x278   :  { %v1768_v63 = vpop.f32.mrb[49].mxu1 }
 0x279   :  { %v1769_v0 = vadd.f32 %v1768_v63, %v1767_v62  ;;  %v1770_v1 = vpop.f32.mrb[50].mxu1  ;;  %v844_v2 = vpack.c.bf16 %v816_v61, %v815_v60 }
 0x27a   :  { %v1771_v3 = vpop.f32.mrb[51].mxu1 }
 0x27b   :  { %v715_v4 = vadd.f32 %v1769_v0, %v2616_v51  ;;  %2044 = vmatmul.mubr.bf16.gmra.mrb[4].mxu0 %v844_v2  ;;  %v1772_v5 = vadd.f32 %v1771_v3, %v1770_v1 }
 0x27d   :  { %v718_v6 = vadd.f32 %v1772_v5, %v2616_v51  ;;  %v817_v7 = vmax.f32 %v715_v4, 0.0 }
 0x27f   :  { %v818_v8 = vmax.f32 %v718_v6, 0.0  ;;  %v1773_v9 = vpop.f32.mrb[52].mxu1 }
 0x280   :  { %v1774_v10 = vpop.f32.mrb[53].mxu1 }
 0x281   :  { %v1775_v12 = vadd.f32 %v1774_v10, %v1773_v9  ;;  %v1776_v14 = vpop.f32.mrb[54].mxu1  ;;  %v845_v38 = vpack.c.bf16 %v818_v8, %v817_v7 }
 0x282   :  { %v1777_v39 = vpop.f32.mrb[55].mxu1 }
 0x283   :  { %v723_v42 = vadd.f32 %v1775_v12, %v2616_v51  ;;  %v1778_v43 = vadd.f32 %v1777_v39, %v1776_v14  ;;  %2047 = vmatprep.mubr.bf16.mxu0 %v845_v38 }
 0x285   :  { %v726_v49 = vadd.f32 %v1778_v43, %v2616_v51  ;;  %v819_v50 = vmax.f32 %v723_v42, 0.0 }
 0x287   :  { %v820_v52 = vmax.f32 %v726_v49, 0.0  ;;  %v1779_v53 = vpop.f32.mrb[56].mxu1 }
 0x288   :  { %v1780_v54 = vpop.f32.mrb[57].mxu1 }
 0x289   :  { %v1781_v55 = vadd.f32 %v1780_v54, %v1779_v53  ;;  %v1782_v56 = vpop.f32.mrb[58].mxu1  ;;  %v846_v57 = vpack.c.bf16 %v820_v52, %v819_v50 }
 0x28a   :  { %v1783_v58 = vpop.f32.mrb[59].mxu1 }
 0x28b   :  { %v731_v59 = vadd.f32 %v1781_v55, %v2616_v51  ;;  %v1784_v60 = vadd.f32 %v1783_v58, %v1782_v56  ;;  %2048 = vmatmul.mubr.bf16.gmra.mrb[8].mxu0 %v846_v57 }
 0x28d   :  { %v734_v61 = vadd.f32 %v1784_v60, %v2616_v51  ;;  %v821_v62 = vmax.f32 %v731_v59, 0.0 }
 0x28f   :  { %v822_v63 = vmax.f32 %v734_v61, 0.0  ;;  %v1785_v0 = vpop.f32.mrb[60].mxu1 }
 0x290   :  { %v1786_v1 = vpop.f32.mrb[61].mxu1 }
 0x291   :  { %v1787_v2 = vadd.f32 %v1786_v1, %v1785_v0  ;;  %v1788_v3 = vpop.f32.mrb[62].mxu1  ;;  %v847_v4 = vpack.c.bf16 %v822_v63, %v821_v62 }
 0x292   :  { %v1789_v5 = vpop.f32.mrb[63].mxu1 }
 0x293   :  { %v739_v6 = vadd.f32 %v1787_v2, %v2616_v51  ;;  %v1790_v7 = vadd.f32 %v1789_v5, %v1788_v3  ;;  %2051 = vmatprep.mubr.bf16.mxu0 %v847_v4 }
 0x295   :  { %v742_v8 = vadd.f32 %v1790_v7, %v2616_v51  ;;  %v823_v9 = vmax.f32 %v739_v6, 0.0 }
 0x297   :  { %v824_v10 = vmax.f32 %v742_v8, 0.0  ;;  %v1791_v12 = vpop.f32.mrb[64].mxu1 }
 0x298   :  { %v1792_v14 = vpop.f32.mrb[65].mxu1 }
 0x299   :  { %v1793_v38 = vadd.f32 %v1792_v14, %v1791_v12  ;;  %v1794_v39 = vpop.f32.mrb[66].mxu1  ;;  %v848_v42 = vpack.c.bf16 %v824_v10, %v823_v9 }
 0x29a   :  { %v1795_v43 = vpop.f32.mrb[67].mxu1 }
 0x29b   :  { %v747_v49 = vadd.f32 %v1793_v38, %v2616_v51  ;;  %v1796_v50 = vadd.f32 %v1795_v43, %v1794_v39  ;;  %2052 = vmatmul.mubr.bf16.gmra.mrb[12].mxu0 %v848_v42 }
 0x29d   :  { %v750_v52 = vadd.f32 %v1796_v50, %v2616_v51  ;;  %v825_v53 = vmax.f32 %v747_v49, 0.0 }
 0x29f   :  { %v826_v54 = vmax.f32 %v750_v52, 0.0  ;;  %v1797_v55 = vpop.f32.mrb[68].mxu1 }
 0x2a0   :  { %v1798_v56 = vpop.f32.mrb[69].mxu1 }
 0x2a1   :  { %v1799_v57 = vadd.f32 %v1798_v56, %v1797_v55  ;;  %v1800_v58 = vpop.f32.mrb[70].mxu1  ;;  %v849_v59 = vpack.c.bf16 %v826_v54, %v825_v53 }
 0x2a2   :  { %v1801_v60 = vpop.f32.mrb[71].mxu1 }
 0x2a3   :  { %v755_v61 = vadd.f32 %v1799_v57, %v2616_v51  ;;  %v1802_v62 = vadd.f32 %v1801_v60, %v1800_v58  ;;  %2055 = vmatprep.mubr.bf16.mxu0 %v849_v59 }
 0x2a5   :  { %v758_v63 = vadd.f32 %v1802_v62, %v2616_v51  ;;  %v827_v0 = vmax.f32 %v755_v61, 0.0 }
 0x2a7   :  { %v828_v1 = vmax.f32 %v758_v63, 0.0  ;;  %v1803_v2 = vpop.f32.mrb[72].mxu1 }
 0x2a8   :  { %v1804_v3 = vpop.f32.mrb[73].mxu1 }
 0x2a9   :  { %v850_v4 = vpack.c.bf16 %v828_v1, %v827_v0  ;;  %v1805_v5 = vadd.f32 %v1804_v3, %v1803_v2  ;;  %v1806_v6 = vpop.f32.mrb[74].mxu1 }
 0x2aa   :  { %v1807_v7 = vpop.f32.mrb[75].mxu1 }
 0x2ab   :  { %2056 = vmatmul.mubr.bf16.gmra.mrb[16].mxu0 %v850_v4  ;;  %v763_v8 = vadd.f32 %v1805_v5, %v2616_v51  ;;  %v1808_v9 = vadd.f32 %v1807_v7, %v1806_v6 }
 0x2ad   :  { %v766_v10 = vadd.f32 %v1808_v9, %v2616_v51  ;;  %v829_v12 = vmax.f32 %v763_v8, 0.0 }
 0x2af   :  { %v830_v14 = vmax.f32 %v766_v10, 0.0  ;;  %v1809_v38 = vpop.f32.mrb[76].mxu1 }
 0x2b0   :  { %v1810_v39 = vpop.f32.mrb[77].mxu1 }
 0x2b1   :  { %v1811_v42 = vadd.f32 %v1810_v39, %v1809_v38  ;;  %v1812_v43 = vpop.f32.mrb[78].mxu1  ;;  %v851_v49 = vpack.c.bf16 %v830_v14, %v829_v12 }
 0x2b2   :  { %v1813_v50 = vpop.f32.mrb[79].mxu1 }
 0x2b3   :  { %v771_v52 = vadd.f32 %v1811_v42, %v2616_v51  ;;  %v1814_v53 = vadd.f32 %v1813_v50, %v1812_v43  ;;  %2059 = vmatprep.mubr.bf16.mxu0 %v851_v49 }
 0x2b5   :  { %v774_v54 = vadd.f32 %v1814_v53, %v2616_v51  ;;  %v831_v55 = vmax.f32 %v771_v52, 0.0 }
 0x2b7   :  { %v832_v56 = vmax.f32 %v774_v54, 0.0  ;;  %v1815_v57 = vpop.f32.mrb[80].mxu1 }
 0x2b8   :  { %v1816_v58 = vpop.f32.mrb[81].mxu1 }
 0x2b9   :  { %v852_v59 = vpack.c.bf16 %v832_v56, %v831_v55  ;;  %v1817_v60 = vadd.f32 %v1816_v58, %v1815_v57  ;;  %v1818_v61 = vpop.f32.mrb[82].mxu1 }
 0x2ba   :  { %v1819_v62 = vpop.f32.mrb[83].mxu1 }
 0x2bb   :  { %2060 = vmatmul.mubr.bf16.gmra.mrb[20].mxu0 %v852_v59  ;;  %v779_v63 = vadd.f32 %v1817_v60, %v2616_v51  ;;  %v1820_v0 = vadd.f32 %v1819_v62, %v1818_v61 }
 0x2bd   :  { %v782_v1 = vadd.f32 %v1820_v0, %v2616_v51  ;;  %v833_v2 = vmax.f32 %v779_v63, 0.0 }
 0x2bf   :  { %v834_v3 = vmax.f32 %v782_v1, 0.0  ;;  %v1821_v4 = vpop.f32.mrb[84].mxu1 }
 0x2c0   :  { %v1822_v5 = vpop.f32.mrb[85].mxu1 }
 0x2c1   :  { %v1823_v6 = vadd.f32 %v1822_v5, %v1821_v4  ;;  %v1824_v7 = vpop.f32.mrb[86].mxu1  ;;  %v853_v8 = vpack.c.bf16 %v834_v3, %v833_v2 }
 0x2c2   :  { %v1825_v9 = vpop.f32.mrb[87].mxu1 }
 0x2c3   :  { %v787_v10 = vadd.f32 %v1823_v6, %v2616_v51  ;;  %v1826_v12 = vadd.f32 %v1825_v9, %v1824_v7  ;;  %2063 = vmatprep.mubr.bf16.mxu0 %v853_v8 }
 0x2c5   :  { %v790_v14 = vadd.f32 %v1826_v12, %v2616_v51  ;;  %v835_v38 = vmax.f32 %v787_v10, 0.0 }
 0x2c7   :  { %v836_v39 = vmax.f32 %v790_v14, 0.0  ;;  %v1827_v42 = vpop.f32.mrb[88].mxu1 }
 0x2c8   :  { %v1828_v43 = vpop.f32.mrb[89].mxu1 }
 0x2c9   :  { %v854_v49 = vpack.c.bf16 %v836_v39, %v835_v38  ;;  %v1829_v50 = vadd.f32 %v1828_v43, %v1827_v42  ;;  %v1830_v52 = vpop.f32.mrb[90].mxu1 }
 0x2ca   :  { %v1831_v53 = vpop.f32.mrb[91].mxu1 }
 0x2cb   :  { %2064 = vmatmul.mubr.bf16.gmra.mrb[24].mxu0 %v854_v49  ;;  %v795_v54 = vadd.f32 %v1829_v50, %v2616_v51  ;;  %v1832_v55 = vadd.f32 %v1831_v53, %v1830_v52 }
 0x2cd   :  { %v798_v56 = vadd.f32 %v1832_v55, %v2616_v51  ;;  %v837_v57 = vmax.f32 %v795_v54, 0.0 }
 0x2cf   :  { %v838_v58 = vmax.f32 %v798_v56, 0.0  ;;  %v1833_v59 = vpop.f32.mrb[92].mxu1 }
 0x2d0   :  { %v1834_v60 = vpop.f32.mrb[93].mxu1 }
 0x2d1   :  { %v1835_v61 = vadd.f32 %v1834_v60, %v1833_v59  ;;  %v1836_v62 = vpop.f32.mrb[94].mxu1  ;;  %v855_v63 = vpack.c.bf16 %v838_v58, %v837_v57 }
 0x2d2   :  { %v1837_v0 = vpop.f32.mrb[95].mxu1 }
 0x2d3   :  { %v803_v1 = vadd.f32 %v1835_v61, %v2616_v51  ;;  %v1838_v2 = vadd.f32 %v1837_v0, %v1836_v62  ;;  %2067 = vmatprep.mubr.bf16.mxu0 %v855_v63 }
 0x2d5   :  { %v806_v3 = vadd.f32 %v1838_v2, %v2616_v51  ;;  %v839_v4 = vmax.f32 %v803_v1, 0.0 }
 0x2d7   :  { %v840_v5 = vmax.f32 %v806_v3, 0.0 }
 0x2d9   :  { %v856_v6 = vpack.c.bf16 %v840_v5, %v839_v4 }
 0x2db   :  { %2068 = vmatmul.mubr.bf16.gmra.mrb[28].mxu0 %v856_v6 }
 0x2dc   :  { %1137 = vmatprep.mubr.bf16.mxu0 %v2517_v24 }
 0x33e   :  { %v2041_v7 = vpop.f32.mrb[0].mxu0 }
 0x33f   :  { %v955_v8 = vpop.f32.mrb[1].mxu0 }
 0x340   :  { %v2042_v9 = vpop.f32.mrb[2].mxu0 }
 0x341   :  { %v1083_v10 = vpack.c.bf16 %v2042_v9, %v2041_v7  ;;  %v958_v12 = vpop.f32.mrb[3].mxu0 }
 0x342   :  { %v1082_v14 = vpack.c.bf16 %v958_v12, %v955_v8 }
 0x34e   :  { %v2045_v38 = vpop.f32.mrb[4].mxu0 }
 0x34f   :  { %v971_v39 = vpop.f32.mrb[5].mxu0 }
 0x350   :  { %v2046_v42 = vpop.f32.mrb[6].mxu0 }
 0x351   :  { %v1085_v43 = vpack.c.bf16 %v2046_v42, %v2045_v38  ;;  %v974_v49 = vpop.f32.mrb[7].mxu0 }
 0x352   :  { %v1084_v50 = vpack.c.bf16 %v974_v49, %v971_v39 }
 0x35e   :  { %v2049_v52 = vpop.f32.mrb[8].mxu0 }
 0x35f   :  { %v987_v51 = vpop.f32.mrb[9].mxu0 }
 0x360   :  { %v2050_v53 = vpop.f32.mrb[10].mxu0 }
 0x361   :  { %v1087_v54 = vpack.c.bf16 %v2050_v53, %v2049_v52  ;;  %v990_v55 = vpop.f32.mrb[11].mxu0 }
 0x362   :  { %v1086_v56 = vpack.c.bf16 %v990_v55, %v987_v51 }
 0x36e   :  { %v2053_v57 = vpop.f32.mrb[12].mxu0 }
 0x36f   :  { %v1003_v24 = vpop.f32.mrb[13].mxu0 }
 0x370   :  { %v2054_v58 = vpop.f32.mrb[14].mxu0 }
 0x371   :  { %v1089_v59 = vpack.c.bf16 %v2054_v58, %v2053_v57  ;;  %v1006_v60 = vpop.f32.mrb[15].mxu0 }
 0x372   :  { %v1088_v61 = vpack.c.bf16 %v1006_v60, %v1003_v24 }
 0x37e   :  { %v2057_v62 = vpop.f32.mrb[16].mxu0 }
 0x37f   :  { %v1019_v63 = vpop.f32.mrb[17].mxu0 }
 0x380   :  { %v2058_v0 = vpop.f32.mrb[18].mxu0 }
 0x381   :  { %v1091_v1 = vpack.c.bf16 %v2058_v0, %v2057_v62  ;;  %v1022_v2 = vpop.f32.mrb[19].mxu0 }
 0x382   :  { %v1090_v3 = vpack.c.bf16 %v1022_v2, %v1019_v63 }
 0x384   :  { %1863 = vmatprep.subr.bf16.mxu0 %v1090_v3 }
 0x385   :  { %1864 = vmatpush3.bf16.msra.mxu0 %v1082_v14 }
 0x386   :  { %1865 = vmatprep.subr.bf16.mxu0 %v1091_v1 }
 0x389   :  { %1866 = vmatpush3.bf16.msra.mxu0 %v1083_v10 }
 0x38e   :  { %v2061_v4 = vpop.f32.mrb[20].mxu0 }
 0x38f   :  { %v1035_v5 = vpop.f32.mrb[21].mxu0 }
 0x390   :  { %v2062_v6 = vpop.f32.mrb[22].mxu0 }
 0x391   :  { %v1093_v7 = vpack.c.bf16 %v2062_v6, %v2061_v4  ;;  %v1038_v8 = vpop.f32.mrb[23].mxu0 }
 0x392   :  { %v1092_v9 = vpack.c.bf16 %v1038_v8, %v1035_v5 }
 0x394   :  { %1867 = vmatprep.subr.bf16.mxu0 %v1092_v9 }
 0x395   :  { %1868 = vmatpush3.bf16.msra.mxu0 %v1084_v50 }
 0x396   :  { %1869 = vmatprep.subr.bf16.mxu0 %v1093_v7 }
 0x399   :  { %1870 = vmatpush3.bf16.msra.mxu0 %v1085_v43 }
 0x39e   :  { %v2065_v12 = vpop.f32.mrb[24].mxu0 }
 0x39f   :  { %v1051_v38 = vpop.f32.mrb[25].mxu0 }
 0x3a0   :  { %v2066_v39 = vpop.f32.mrb[26].mxu0 }
 0x3a1   :  { %v1095_v42 = vpack.c.bf16 %v2066_v39, %v2065_v12  ;;  %v1054_v49 = vpop.f32.mrb[27].mxu0 }
 0x3a2   :  { %v1094_v52 = vpack.c.bf16 %v1054_v49, %v1051_v38 }
 0x3a4   :  { %1871 = vmatprep.subr.bf16.mxu0 %v1094_v52 }
 0x3a5   :  { %1872 = vmatpush3.bf16.msra.mxu0 %v1086_v56 }
 0x3a6   :  { %1873 = vmatprep.subr.bf16.mxu0 %v1095_v42 }
 0x3a9   :  { %1874 = vmatpush3.bf16.msra.mxu0 %v1087_v54 }
 0x3ae   :  { %v2069_v10 = vpop.f32.mrb[28].mxu0 }
 0x3af   :  { %v1067_v14 = vpop.f32.mrb[29].mxu0 }
 0x3b0   :  { %v2070_v51 = vpop.f32.mrb[30].mxu0 }
 0x3b1   :  { %v1097_v53 = vpack.c.bf16 %v2070_v51, %v2069_v10  ;;  %v1070_v55 = vpop.f32.mrb[31].mxu0 }
 0x3b2   :  { %v1096_v57 = vpack.c.bf16 %v1070_v55, %v1067_v14 }
 0x3b4   :  { %1875 = vmatprep.subr.bf16.mxu0 %v1096_v57 }
 0x3b5   :  { %1876 = vmatpush3.bf16.msra.mxu0 %v1088_v61 }
 0x3b6   :  { %1877 = vmatprep.subr.bf16.mxu0 %v1097_v53 }
 0x3b9   :  { %1878 = vmatpush3.bf16.msra.mxu0 %v1089_v59 }
 0x3bc   :  { %1138 = vmatmul.mubr.bf16.vlgmr.msra.gmra.mrb[32].mxu0 %v2520_v11 }
 0x3bd   :  { %1145 = vmatprep.mubr.bf16.mxu0 %v2522_v13 }
 0x3c4   :  { %1146 = vmatmul.mubr.bf16.gmra.mrb[36].mxu0 %v2526_v15  ;;  %v2685_v15 = vld [vmem:[%s2995_s5] ss:$0 sm:$0xff]  ;;  %s2414_s5 = smov [#allocation10]  }
 0x3c5   :  { %1153 = vmatprep.mubr.bf16.mxu0 %v2528_v16  ;;  %s1623_s25 = sshll.u32 %s2414_s5, 4  ;;  %s1624_s25 = int_to_ptr.vmem [resolvable:$true] %s1623_s25 }
 0x3c6   :  { %s2376_s26 = scalar_lea.vmem %s1624_s25, 4096  ;;  %p2381_p5 = scmp.lt.s32.totalorder %s1624_s25, %s1624_s25 }
 0x3c7   :  { %p2377_p4 = scmp.ne.s32.totalorder %s1624_s25, %s2376_s26  ;;  %p2382_p6 = scmp.lt.s32.totalorder %s2376_s26, %s2376_s26 }
 0x3c9   :  { %p2383_p7 = por %p2382_p6, %p2381_p5 }
 0x3cb   :  { %p2384_p8 = pnand %p2383_p7, %p2377_p4 }
 0x3cc   :  { %1154 = vmatmul.mubr.bf16.gmra.mrb[40].mxu0 %v2532_v17 }
 0x3cd   :  { %1161 = vmatprep.mubr.bf16.mxu0 %v2534_v18 }
 0x3d4   :  { %1162 = vmatmul.mubr.bf16.gmra.mrb[44].mxu0 %v2538_v19 }
 0x3d5   :  { %1169 = vmatprep.mubr.bf16.mxu0 %v2540_v20 }
 0x3dc   :  { %1170 = vmatmul.mubr.bf16.gmra.mrb[48].mxu0 %v2544_v21 }
 0x3dd   :  { %1177 = vmatprep.mubr.bf16.mxu0 %v2546_v22 }
 0x3e4   :  { %1178 = vmatmul.mubr.bf16.gmra.mrb[52].mxu0 %v2550_v23 }
 0x3e5   :  { %1185 = vmatprep.mubr.bf16.mxu0 %v2552_v25 }
 0x3ec   :  { %1186 = vmatmul.mubr.bf16.gmra.mrb[56].mxu0 %v2556_v26 }
 0x3ed   :  { %1193 = vmatprep.mubr.bf16.mxu0 %v2558_v27 }
 0x3f4   :  { %1194 = vmatmul.mubr.bf16.gmra.mrb[60].mxu0 %v2562_v28 }
 0x3f5   :  { %1201 = vmatprep.mubr.bf16.mxu0 %v2564_v29 }
 0x3fc   :  { %1202 = vmatmul.mubr.bf16.gmra.mrb[64].mxu0 %v2568_v30 }
 0x3fd   :  { %1209 = vmatprep.mubr.bf16.mxu0 %v2570_v31 }
 0x404   :  { %1210 = vmatmul.mubr.bf16.gmra.mrb[68].mxu0 %v2574_v32 }
 0x405   :  { %1217 = vmatprep.mubr.bf16.mxu0 %v2576_v33 }
 0x40c   :  { %1218 = vmatmul.mubr.bf16.gmra.mrb[72].mxu0 %v2580_v34 }
 0x40d   :  { %1225 = vmatprep.mubr.bf16.mxu0 %v2582_v35 }
 0x414   :  { %1226 = vmatmul.mubr.bf16.gmra.mrb[76].mxu0 %v2586_v36 }
 0x415   :  { %1233 = vmatprep.mubr.bf16.mxu0 %v2588_v37 }
 0x41c   :  { %1234 = vmatmul.mubr.bf16.gmra.mrb[80].mxu0 %v2592_v40 }
 0x41d   :  { %1241 = vmatprep.mubr.bf16.mxu0 %v2594_v41 }
 0x424   :  { %1242 = vmatmul.mubr.bf16.gmra.mrb[84].mxu0 %v2598_v44 }
 0x425   :  { %1249 = vmatprep.mubr.bf16.mxu0 %v2600_v45 }
 0x42c   :  { %1250 = vmatmul.mubr.bf16.gmra.mrb[88].mxu0 %v2604_v46 }
 0x42d   :  { %1257 = vmatprep.mubr.bf16.mxu0 %v2606_v47 }
 0x434   :  { %1258 = vmatmul.mubr.bf16.gmra.mrb[92].mxu0 %v2610_v48 }
 0x48f   :  { %v1879_v11 = vpop.f32.mrb[32].mxu0 }
 0x490   :  { %v1880_v13 = vpop.f32.mrb[33].mxu0 }
 0x491   :  { %v1881_v16 = vadd.f32 %v1880_v13, %v1879_v11  ;;  %v1882_v17 = vpop.f32.mrb[34].mxu0 }
 0x492   :  { %v1883_v18 = vpop.f32.mrb[35].mxu0 }
 0x493   :  { %v1884_v19 = vadd.f32 %v1883_v18, %v1882_v17  ;;  %v2688_v20 = vadd.f32 %v1881_v16, %v2685_v15 }
 0x495   :  { %1266 = vmax.xlane.f32.xlu0 %v2688_v20  ;;  %v2692_v22 = vadd.f32 %v1884_v19, %v2685_v15 }
 0x497   :  { %v1885_v21 = vpop.f32.mrb[36].mxu0 }
 0x498   :  { %v1886_v23 = vpop.f32.mrb[37].mxu0 }
 0x499   :  { %v1887_v25 = vadd.f32 %v1886_v23, %v1885_v21  ;;  %1268 = vmax.xlane.f32.xlu0 %v2692_v22  ;;  %v1888_v26 = vpop.f32.mrb[38].mxu0 }
 0x49a   :  { %v1889_v27 = vpop.f32.mrb[39].mxu0 }
 0x49b   :  { %v1890_v28 = vadd.f32 %v1889_v27, %v1888_v26  ;;  %v2696_v29 = vadd.f32 %v1887_v25, %v2685_v15 }
 0x49d   :  { %1270 = vmax.xlane.f32.xlu1 %v2696_v29  ;;  %v2700_v31 = vadd.f32 %v1890_v28, %v2685_v15 }
 0x49f   :  { %v1891_v30 = vpop.f32.mrb[40].mxu0 }
 0x4a0   :  { %v1892_v32 = vpop.f32.mrb[41].mxu0 }
 0x4a1   :  { %v1893_v33 = vadd.f32 %v1892_v32, %v1891_v30  ;;  %v1894_v34 = vpop.f32.mrb[42].mxu0  ;;  %1272 = vmax.xlane.f32.xlu1 %v2700_v31 }
 0x4a2   :  { %v1895_v35 = vpop.f32.mrb[43].mxu0 }
 0x4a3   :  { %v1896_v36 = vadd.f32 %v1895_v35, %v1894_v34  ;;  %v2704_v37 = vadd.f32 %v1893_v33, %v2685_v15 }
 0x4a5   :  { %1274 = vmax.xlane.f32.xlu0 %v2704_v37  ;;  %v2708_v40 = vadd.f32 %v1896_v36, %v2685_v15 }
 0x4a7   :  { %v1897_v41 = vpop.f32.mrb[44].mxu0  ;;  %1276 = vmax.xlane.f32.xlu1 %v2708_v40 }
 0x4a8   :  { %v1898_v44 = vpop.f32.mrb[45].mxu0 }
 0x4a9   :  { %v1899_v45 = vadd.f32 %v1898_v44, %v1897_v41  ;;  %v1900_v46 = vpop.f32.mrb[46].mxu0 }
 0x4aa   :  { %v1901_v47 = vpop.f32.mrb[47].mxu0 }
 0x4ab   :  { %v1902_v48 = vadd.f32 %v1901_v47, %v1900_v46  ;;  %v2712_v43 = vadd.f32 %v1899_v45, %v2685_v15 }
 0x4ad   :  { %1278 = vmax.xlane.f32.xlu0 %v2712_v43  ;;  %v2716_v50 = vadd.f32 %v1902_v48, %v2685_v15 }
 0x4af   :  { %v1903_v54 = vpop.f32.mrb[48].mxu0  ;;  %1280 = vmax.xlane.f32.xlu1 %v2716_v50 }
 0x4b0   :  { %v1904_v56 = vpop.f32.mrb[49].mxu0 }
 0x4b1   :  { %v1905_v24 = vadd.f32 %v1904_v56, %v1903_v54  ;;  %v1906_v58 = vpop.f32.mrb[50].mxu0 }
 0x4b2   :  { %v1907_v59 = vpop.f32.mrb[51].mxu0 }
 0x4b3   :  { %v1908_v60 = vadd.f32 %v1907_v59, %v1906_v58  ;;  %v2720_v61 = vadd.f32 %v1905_v24, %v2685_v15 }
 0x4b5   :  { %1282 = vmax.xlane.f32.xlu0 %v2720_v61  ;;  %v2724_v62 = vadd.f32 %v1908_v60, %v2685_v15 }
 0x4b7   :  { %v1909_v63 = vpop.f32.mrb[52].mxu0  ;;  %1284 = vmax.xlane.f32.xlu1 %v2724_v62 }
 0x4b8   :  { %v1910_v0 = vpop.f32.mrb[53].mxu0 }
 0x4b9   :  { %v1911_v1 = vadd.f32 %v1910_v0, %v1909_v63  ;;  %v1912_v2 = vpop.f32.mrb[54].mxu0 }
 0x4ba   :  { %v1913_v3 = vpop.f32.mrb[55].mxu0 }
 0x4bb   :  { %v1914_v4 = vadd.f32 %v1913_v3, %v1912_v2  ;;  %v2728_v5 = vadd.f32 %v1911_v1, %v2685_v15 }
 0x4bd   :  { %1286 = vmax.xlane.f32.xlu0 %v2728_v5  ;;  %v2732_v6 = vadd.f32 %v1914_v4, %v2685_v15 }
 0x4bf   :  { %v1915_v7 = vpop.f32.mrb[56].mxu0  ;;  %1288 = vmax.xlane.f32.xlu1 %v2732_v6 }
 0x4c0   :  { %v1916_v8 = vpop.f32.mrb[57].mxu0 }
 0x4c1   :  { %v1917_v9 = vadd.f32 %v1916_v8, %v1915_v7  ;;  %v1918_v12 = vpop.f32.mrb[58].mxu0 }
 0x4c2   :  { %v1919_v38 = vpop.f32.mrb[59].mxu0 }
 0x4c3   :  { %v1920_v39 = vadd.f32 %v1919_v38, %v1918_v12  ;;  %v2736_v42 = vadd.f32 %v1917_v9, %v2685_v15 }
 0x4c5   :  { %1290 = vmax.xlane.f32.xlu0 %v2736_v42  ;;  %v2740_v49 = vadd.f32 %v1920_v39, %v2685_v15 }
 0x4c7   :  { %v1921_v52 = vpop.f32.mrb[60].mxu0  ;;  %1292 = vmax.xlane.f32.xlu1 %v2740_v49 }
 0x4c8   :  { %v1922_v10 = vpop.f32.mrb[61].mxu0 }
 0x4c9   :  { %v1923_v14 = vadd.f32 %v1922_v10, %v1921_v52  ;;  %v1924_v51 = vpop.f32.mrb[62].mxu0 }
 0x4ca   :  { %v1925_v53 = vpop.f32.mrb[63].mxu0 }
 0x4cb   :  { %v1926_v55 = vadd.f32 %v1925_v53, %v1924_v51  ;;  %v2744_v57 = vadd.f32 %v1923_v14, %v2685_v15 }
 0x4cd   :  { %1294 = vmax.xlane.f32.xlu0 %v2744_v57  ;;  %v2748_v11 = vadd.f32 %v1926_v55, %v2685_v15 }
 0x4cf   :  { %v1927_v13 = vpop.f32.mrb[64].mxu0  ;;  %1296 = vmax.xlane.f32.xlu1 %v2748_v11 }
 0x4d0   :  { %v1928_v16 = vpop.f32.mrb[65].mxu0 }
 0x4d1   :  { %v1929_v17 = vadd.f32 %v1928_v16, %v1927_v13  ;;  %v1930_v18 = vpop.f32.mrb[66].mxu0 }
 0x4d2   :  { %v1931_v19 = vpop.f32.mrb[67].mxu0 }
 0x4d3   :  { %v1932_v21 = vadd.f32 %v1931_v19, %v1930_v18  ;;  %v2752_v23 = vadd.f32 %v1929_v17, %v2685_v15 }
 0x4d5   :  { %1298 = vmax.xlane.f32.xlu0 %v2752_v23  ;;  %v2756_v25 = vadd.f32 %v1932_v21, %v2685_v15 }
 0x4d7   :  { %v1933_v26 = vpop.f32.mrb[68].mxu0  ;;  %1300 = vmax.xlane.f32.xlu1 %v2756_v25 }
 0x4d8   :  { %v1934_v27 = vpop.f32.mrb[69].mxu0 }
 0x4d9   :  { %v1935_v28 = vadd.f32 %v1934_v27, %v1933_v26  ;;  %v1936_v30 = vpop.f32.mrb[70].mxu0 }
 0x4da   :  { %v1937_v32 = vpop.f32.mrb[71].mxu0 }
 0x4db   :  { %v1938_v33 = vadd.f32 %v1937_v32, %v1936_v30  ;;  %v2760_v34 = vadd.f32 %v1935_v28, %v2685_v15 }
 0x4dd   :  { %1302 = vmax.xlane.f32.xlu0 %v2760_v34  ;;  %v2764_v35 = vadd.f32 %v1938_v33, %v2685_v15 }
 0x4df   :  { %v1939_v36 = vpop.f32.mrb[72].mxu0  ;;  %1304 = vmax.xlane.f32.xlu1 %v2764_v35 }
 0x4e0   :  { %v1940_v41 = vpop.f32.mrb[73].mxu0 }
 0x4e1   :  { %v1941_v44 = vadd.f32 %v1940_v41, %v1939_v36  ;;  %v1942_v45 = vpop.f32.mrb[74].mxu0 }
 0x4e2   :  { %v1943_v46 = vpop.f32.mrb[75].mxu0 }
 0x4e3   :  { %v1944_v47 = vadd.f32 %v1943_v46, %v1942_v45  ;;  %v2768_v48 = vadd.f32 %v1941_v44, %v2685_v15 }
 0x4e5   :  { %1306 = vmax.xlane.f32.xlu0 %v2768_v48  ;;  %v2772_v54 = vadd.f32 %v1944_v47, %v2685_v15 }
 0x4e7   :  { %v1945_v56 = vpop.f32.mrb[76].mxu0  ;;  %1308 = vmax.xlane.f32.xlu1 %v2772_v54 }
 0x4e8   :  { %v1946_v24 = vpop.f32.mrb[77].mxu0 }
 0x4e9   :  { %v1947_v58 = vadd.f32 %v1946_v24, %v1945_v56  ;;  %v1948_v59 = vpop.f32.mrb[78].mxu0 }
 0x4ea   :  { %v1949_v60 = vpop.f32.mrb[79].mxu0 }
 0x4eb   :  { %v1950_v63 = vadd.f32 %v1949_v60, %v1948_v59  ;;  %v2776_v0 = vadd.f32 %v1947_v58, %v2685_v15 }
 0x4ed   :  { %1310 = vmax.xlane.f32.xlu0 %v2776_v0  ;;  %v2780_v1 = vadd.f32 %v1950_v63, %v2685_v15 }
 0x4ef   :  { %v1951_v2 = vpop.f32.mrb[80].mxu0  ;;  %1312 = vmax.xlane.f32.xlu1 %v2780_v1 }
 0x4f0   :  { %v1952_v3 = vpop.f32.mrb[81].mxu0 }
 0x4f1   :  { %v1953_v4 = vadd.f32 %v1952_v3, %v1951_v2  ;;  %v1954_v7 = vpop.f32.mrb[82].mxu0 }
 0x4f2   :  { %v1955_v8 = vpop.f32.mrb[83].mxu0 }
 0x4f3   :  { %v1956_v9 = vadd.f32 %v1955_v8, %v1954_v7  ;;  %v2784_v12 = vadd.f32 %v1953_v4, %v2685_v15 }
 0x4f5   :  { %1314 = vmax.xlane.f32.xlu0 %v2784_v12  ;;  %v2788_v38 = vadd.f32 %v1956_v9, %v2685_v15 }
 0x4f7   :  { %v1957_v39 = vpop.f32.mrb[84].mxu0  ;;  %1316 = vmax.xlane.f32.xlu1 %v2788_v38 }
 0x4f8   :  { %v1958_v52 = vpop.f32.mrb[85].mxu0 }
 0x4f9   :  { %v1959_v10 = vadd.f32 %v1958_v52, %v1957_v39  ;;  %v1960_v14 = vpop.f32.mrb[86].mxu0 }
 0x4fa   :  { %v1961_v51 = vpop.f32.mrb[87].mxu0 }
 0x4fb   :  { %v1962_v53 = vadd.f32 %v1961_v51, %v1960_v14  ;;  %v2792_v55 = vadd.f32 %v1959_v10, %v2685_v15 }
 0x4fd   :  { %1318 = vmax.xlane.f32.xlu0 %v2792_v55  ;;  %v2796_v13 = vadd.f32 %v1962_v53, %v2685_v15 }
 0x4ff   :  { %v1963_v16 = vpop.f32.mrb[88].mxu0  ;;  %1320 = vmax.xlane.f32.xlu1 %v2796_v13 }
 0x500   :  { %v1964_v17 = vpop.f32.mrb[89].mxu0 }
 0x501   :  { %v1965_v18 = vadd.f32 %v1964_v17, %v1963_v16  ;;  %v1966_v19 = vpop.f32.mrb[90].mxu0 }
 0x502   :  { %v1967_v21 = vpop.f32.mrb[91].mxu0 }
 0x503   :  { %v1968_v26 = vadd.f32 %v1967_v21, %v1966_v19  ;;  %v2800_v27 = vadd.f32 %v1965_v18, %v2685_v15 }
 0x505   :  { %1322 = vmax.xlane.f32.xlu0 %v2800_v27  ;;  %v2804_v28 = vadd.f32 %v1968_v26, %v2685_v15 }
 0x507   :  { %v1969_v30 = vpop.f32.mrb[92].mxu0  ;;  %1324 = vmax.xlane.f32.xlu1 %v2804_v28 }
 0x508   :  { %v1970_v32 = vpop.f32.mrb[93].mxu0 }
 0x509   :  { %v1971_v33 = vadd.f32 %v1970_v32, %v1969_v30  ;;  %v1972_v36 = vpop.f32.mrb[94].mxu0 }
 0x50a   :  { %v1973_v41 = vpop.f32.mrb[95].mxu0 }
 0x50b   :  { %v1974_v44 = vadd.f32 %v1973_v41, %v1972_v36  ;;  %v2808_v45 = vadd.f32 %v1971_v33, %v2685_v15 }
 0x50d   :  { %1326 = vmax.xlane.f32.xlu0 %v2808_v45  ;;  %v2812_v46 = vadd.f32 %v1974_v44, %v2685_v15 }
 0x50f   :  { %1328 = vmax.xlane.f32.xlu1 %v2812_v46 }
 0x522   :  { %v1267_v47 = vpop.xlane.xlu0 %1266 }
 0x523   :  { %v2816_v56 = vsub.f32 %v2688_v20, %v1267_v47 }
 0x525   :  { %v1362_v24 = vmul.f32 1.442695, %v2816_v56 }
 0x526   :  { %v1269_v58 = vpop.xlane.xlu0 %1268 }
 0x527   :  { %2160 = vpow2.f32 %v1362_v24  ;;  %v2820_v59 = vsub.f32 %v2692_v22, %v1269_v58 }
 0x529   :  { %v1364_v60 = vmul.f32 1.442695, %v2820_v59 }
 0x52a   :  { %v1271_v63 = vpop.xlane.xlu1 %1270 }
 0x52b   :  { %2162 = vpow2.f32 %v1364_v60  ;;  %v2824_v15 = vsub.f32 %v2696_v29, %v1271_v63 }
 0x52d   :  { %v1366_v2 = vmul.f32 1.442695, %v2824_v15 }
 0x52e   :  { %v1273_v3 = vpop.xlane.xlu1 %1272 }
 0x52f   :  { %2164 = vpow2.f32 %v1366_v2  ;;  %v2828_v20 = vsub.f32 %v2700_v31, %v1273_v3 }
 0x531   :  { %v2161_v4 = vpop.eup %2160  ;;  %v1368_v7 = vmul.f32 1.442695, %v2828_v20 }
 0x532   :  { %1426 = vadd.xlane.f32.xlu0 %v2161_v4  ;;  %v1275_v22 = vpop.xlane.xlu0 %1274 }
 0x533   :  { %2166 = vpow2.f32 %v1368_v7  ;;  %v2832_v8 = vsub.f32 %v2704_v37, %v1275_v22 }
 0x534   :  { %v1277_v9 = vpop.xlane.xlu1 %1276 }
 0x535   :  { %v2163_v39 = vpop.eup %2162  ;;  %v1370_v29 = vmul.f32 1.442695, %v2832_v8  ;;  %v2836_v52 = vsub.f32 %v2708_v40, %v1277_v9 }
 0x536   :  { %1428 = vadd.xlane.f32.xlu1 %v2163_v39 }
 0x537   :  { %2168 = vpow2.f32 %v1370_v29  ;;  %v1372_v31 = vmul.f32 1.442695, %v2836_v52 }
 0x539   :  { %v2165_v10 = vpop.eup %2164  ;;  %2170 = vpow2.f32 %v1372_v31 }
 0x53a   :  { %1430 = vadd.xlane.f32.xlu0 %v2165_v10  ;;  %v1279_v14 = vpop.xlane.xlu0 %1278 }
 0x53b   :  { %v2840_v51 = vsub.f32 %v2712_v43, %v1279_v14 }
 0x53c   :  { %v1281_v37 = vpop.xlane.xlu1 %1280 }
 0x53d   :  { %v2167_v53 = vpop.eup %2166  ;;  %v1374_v16 = vmul.f32 1.442695, %v2840_v51  ;;  %v2844_v17 = vsub.f32 %v2716_v50, %v1281_v37 }
 0x53e   :  { %1432 = vadd.xlane.f32.xlu1 %v2167_v53 }
 0x53f   :  { %2172 = vpow2.f32 %v1374_v16  ;;  %v1376_v40 = vmul.f32 1.442695, %v2844_v17 }
 0x541   :  { %v2169_v18 = vpop.eup %2168  ;;  %2174 = vpow2.f32 %v1376_v40 }
 0x542   :  { %1434 = vadd.xlane.f32.xlu0 %v2169_v18  ;;  %v1283_v19 = vpop.xlane.xlu0 %1282 }
 0x543   :  { %v2171_v21 = vpop.eup %2170  ;;  %v2848_v26 = vsub.f32 %v2720_v61, %v1283_v19 }
 0x544   :  { %v1285_v43 = vpop.xlane.xlu1 %1284  ;;  %1436 = vadd.xlane.f32.xlu1 %v2171_v21 }
 0x545   :  { %v1378_v30 = vmul.f32 1.442695, %v2848_v26  ;;  %v2852_v32 = vsub.f32 %v2724_v62, %v1285_v43 }
 0x547   :  { %2176 = vpow2.f32 %v1378_v30  ;;  %v1380_v50 = vmul.f32 1.442695, %v2852_v32 }
 0x549   :  { %v2173_v33 = vpop.eup %2172  ;;  %2178 = vpow2.f32 %v1380_v50 }
 0x54a   :  { %1438 = vadd.xlane.f32.xlu0 %v2173_v33  ;;  %v1287_v36 = vpop.xlane.xlu0 %1286 }
 0x54b   :  { %v2175_v41 = vpop.eup %2174  ;;  %v2856_v44 = vsub.f32 %v2728_v5, %v1287_v36 }
 0x54c   :  { %v1289_v61 = vpop.xlane.xlu1 %1288  ;;  %1440 = vadd.xlane.f32.xlu1 %v2175_v41 }
 0x54d   :  { %v1382_v47 = vmul.f32 1.442695, %v2856_v44  ;;  %v2860_v24 = vsub.f32 %v2732_v6, %v1289_v61 }
 0x54f   :  { %2180 = vpow2.f32 %v1382_v47  ;;  %v1384_v62 = vmul.f32 1.442695, %v2860_v24 }
 0x551   :  { %v2177_v58 = vpop.eup %2176  ;;  %2182 = vpow2.f32 %v1384_v62 }
 0x552   :  { %1442 = vadd.xlane.f32.xlu0 %v2177_v58  ;;  %v1291_v60 = vpop.xlane.xlu0 %1290 }
 0x553   :  { %v2179_v63 = vpop.eup %2178  ;;  %v2864_v2 = vsub.f32 %v2736_v42, %v1291_v60 }
 0x554   :  { %v1293_v5 = vpop.xlane.xlu1 %1292  ;;  %1444 = vadd.xlane.f32.xlu1 %v2179_v63 }
 0x555   :  { %v1386_v3 = vmul.f32 1.442695, %v2864_v2  ;;  %v2868_v4 = vsub.f32 %v2740_v49, %v1293_v5 }
 0x557   :  { %2184 = vpow2.f32 %v1386_v3  ;;  %v1388_v6 = vmul.f32 1.442695, %v2868_v4 }
 0x559   :  { %v2181_v7 = vpop.eup %2180  ;;  %2186 = vpow2.f32 %v1388_v6 }
 0x55a   :  { %1446 = vadd.xlane.f32.xlu0 %v2181_v7  ;;  %v1295_v22 = vpop.xlane.xlu0 %1294 }
 0x55b   :  { %v2183_v9 = vpop.eup %2182  ;;  %v2872_v39 = vsub.f32 %v2744_v57, %v1295_v22 }
 0x55c   :  { %v1297_v42 = vpop.xlane.xlu1 %1296  ;;  %1448 = vadd.xlane.f32.xlu1 %v2183_v9 }
 0x55d   :  { %v1390_v29 = vmul.f32 1.442695, %v2872_v39  ;;  %v2876_v31 = vsub.f32 %v2748_v11, %v1297_v42 }
 0x55f   :  { %2188 = vpow2.f32 %v1390_v29  ;;  %v1392_v49 = vmul.f32 1.442695, %v2876_v31 }
 0x561   :  { %v2185_v10 = vpop.eup %2184  ;;  %2190 = vpow2.f32 %v1392_v49 }
 0x562   :  { %1450 = vadd.xlane.f32.xlu0 %v2185_v10  ;;  %v1299_v14 = vpop.xlane.xlu0 %1298 }
 0x563   :  { %v2187_v37 = vpop.eup %2186  ;;  %v2880_v53 = vsub.f32 %v2752_v23, %v1299_v14 }
 0x564   :  { %v1301_v57 = vpop.xlane.xlu1 %1300  ;;  %1452 = vadd.xlane.f32.xlu1 %v2187_v37 }
 0x565   :  { %v1394_v16 = vmul.f32 1.442695, %v2880_v53  ;;  %v2884_v40 = vsub.f32 %v2756_v25, %v1301_v57 }
 0x567   :  { %2192 = vpow2.f32 %v1394_v16  ;;  %v1396_v11 = vmul.f32 1.442695, %v2884_v40 }
 0x569   :  { %v2189_v18 = vpop.eup %2188  ;;  %2194 = vpow2.f32 %v1396_v11 }
 0x56a   :  { %1454 = vadd.xlane.f32.xlu0 %v2189_v18  ;;  %v1303_v19 = vpop.xlane.xlu0 %1302 }
 0x56b   :  { %v2191_v21 = vpop.eup %2190  ;;  %v2888_v43 = vsub.f32 %v2760_v34, %v1303_v19 }
 0x56c   :  { %v1305_v23 = vpop.xlane.xlu1 %1304  ;;  %1456 = vadd.xlane.f32.xlu1 %v2191_v21 }
 0x56d   :  { %v1398_v30 = vmul.f32 1.442695, %v2888_v43  ;;  %v2892_v50 = vsub.f32 %v2764_v35, %v1305_v23 }
 0x56f   :  { %2196 = vpow2.f32 %v1398_v30  ;;  %v1400_v25 = vmul.f32 1.442695, %v2892_v50 }
 0x571   :  { %v2193_v33 = vpop.eup %2192  ;;  %2198 = vpow2.f32 %v1400_v25 }
 0x572   :  { %1458 = vadd.xlane.f32.xlu0 %v2193_v33  ;;  %v1307_v36 = vpop.xlane.xlu0 %1306 }
 0x573   :  { %v2195_v41 = vpop.eup %2194  ;;  %v2896_v61 = vsub.f32 %v2768_v48, %v1307_v36 }
 0x574   :  { %v1309_v34 = vpop.xlane.xlu1 %1308  ;;  %1460 = vadd.xlane.f32.xlu1 %v2195_v41 }
 0x575   :  { %v1402_v47 = vmul.f32 1.442695, %v2896_v61  ;;  %v2900_v62 = vsub.f32 %v2772_v54, %v1309_v34 }
 0x577   :  { %2200 = vpow2.f32 %v1402_v47  ;;  %v1404_v35 = vmul.f32 1.442695, %v2900_v62 }
 0x579   :  { %v2197_v58 = vpop.eup %2196  ;;  %2202 = vpow2.f32 %v1404_v35 }
 0x57a   :  { %1462 = vadd.xlane.f32.xlu0 %v2197_v58  ;;  %v1311_v60 = vpop.xlane.xlu0 %1310 }
 0x57b   :  { %v2199_v63 = vpop.eup %2198  ;;  %v2904_v5 = vsub.f32 %v2776_v0, %v1311_v60 }
 0x57c   :  { %v1313_v48 = vpop.xlane.xlu1 %1312  ;;  %1464 = vadd.xlane.f32.xlu1 %v2199_v63 }
 0x57d   :  { %v1406_v3 = vmul.f32 1.442695, %v2904_v5  ;;  %v2908_v6 = vsub.f32 %v2780_v1, %v1313_v48 }
 0x57f   :  { %2204 = vpow2.f32 %v1406_v3  ;;  %v1408_v54 = vmul.f32 1.442695, %v2908_v6 }
 0x581   :  { %v2201_v7 = vpop.eup %2200  ;;  %2206 = vpow2.f32 %v1408_v54 }
 0x582   :  { %1466 = vadd.xlane.f32.xlu0 %v2201_v7  ;;  %v1315_v22 = vpop.xlane.xlu0 %1314 }
 0x583   :  { %v2203_v9 = vpop.eup %2202  ;;  %v2912_v42 = vsub.f32 %v2784_v12, %v1315_v22 }
 0x584   :  { %v1317_v0 = vpop.xlane.xlu1 %1316  ;;  %1468 = vadd.xlane.f32.xlu1 %v2203_v9 }
 0x585   :  { %v1410_v29 = vmul.f32 1.442695, %v2912_v42  ;;  %v2916_v49 = vsub.f32 %v2788_v38, %v1317_v0 }
 0x587   :  { %2208 = vpow2.f32 %v1410_v29  ;;  %v1412_v1 = vmul.f32 1.442695, %v2916_v49 }
 0x589   :  { %v2205_v10 = vpop.eup %2204  ;;  %2210 = vpow2.f32 %v1412_v1 }
 0x58a   :  { %1470 = vadd.xlane.f32.xlu0 %v2205_v10  ;;  %v1319_v14 = vpop.xlane.xlu0 %1318 }
 0x58b   :  { %v2207_v37 = vpop.eup %2206  ;;  %v2920_v57 = vsub.f32 %v2792_v55, %v1319_v14 }
 0x58c   :  { %v1321_v12 = vpop.xlane.xlu1 %1320  ;;  %1472 = vadd.xlane.f32.xlu1 %v2207_v37 }
 0x58d   :  { %v1414_v16 = vmul.f32 1.442695, %v2920_v57  ;;  %v2924_v11 = vsub.f32 %v2796_v13, %v1321_v12 }
 0x58f   :  { %2212 = vpow2.f32 %v1414_v16  ;;  %v1416_v38 = vmul.f32 1.442695, %v2924_v11 }
 0x591   :  { %v2209_v18 = vpop.eup %2208  ;;  %2214 = vpow2.f32 %v1416_v38 }
 0x592   :  { %1474 = vadd.xlane.f32.xlu0 %v2209_v18  ;;  %v1323_v19 = vpop.xlane.xlu0 %1322 }
 0x593   :  { %v2211_v21 = vpop.eup %2210  ;;  %v2928_v23 = vsub.f32 %v2800_v27, %v1323_v19 }
 0x594   :  { %v1325_v55 = vpop.xlane.xlu1 %1324  ;;  %1476 = vadd.xlane.f32.xlu1 %v2211_v21 }
 0x595   :  { %v1418_v30 = vmul.f32 1.442695, %v2928_v23  ;;  %v2932_v25 = vsub.f32 %v2804_v28, %v1325_v55 }
 0x597   :  { %2216 = vpow2.f32 %v1418_v30  ;;  %v1420_v13 = vmul.f32 1.442695, %v2932_v25 }
 0x599   :  { %v2213_v33 = vpop.eup %2212  ;;  %2218 = vpow2.f32 %v1420_v13 }
 0x59a   :  { %1478 = vadd.xlane.f32.xlu0 %v2213_v33  ;;  %v1327_v36 = vpop.xlane.xlu0 %1326 }
 0x59b   :  { %v2215_v41 = vpop.eup %2214  ;;  %v2936_v34 = vsub.f32 %v2808_v45, %v1327_v36 }
 0x59c   :  { %v1329_v27 = vpop.xlane.xlu1 %1328  ;;  %1480 = vadd.xlane.f32.xlu1 %v2215_v41 }
 0x59d   :  { %v1422_v47 = vmul.f32 1.442695, %v2936_v34  ;;  %v2940_v35 = vsub.f32 %v2812_v46, %v1329_v27 }
 0x59f   :  { %2220 = vpow2.f32 %v1422_v47  ;;  %v1424_v28 = vmul.f32 1.442695, %v2940_v35 }
 0x5a1   :  { %v2217_v58 = vpop.eup %2216  ;;  %2222 = vpow2.f32 %v1424_v28 }
 0x5a2   :  { %1482 = vadd.xlane.f32.xlu0 %v2217_v58 }
 0x5a3   :  { %v2219_v60 = vpop.eup %2218 }
 0x5a4   :  { %1484 = vadd.xlane.f32.xlu1 %v2219_v60 }
 0x5a9   :  { %v2221_v63 = vpop.eup %2220 }
 0x5aa   :  { %1486 = vadd.xlane.f32.xlu0 %v2221_v63 }
 0x5ab   :  { %v2223_v48 = vpop.eup %2222 }
 0x5ac   :  { %1488 = vadd.xlane.f32.xlu1 %v2223_v48 }
 0x5bf   :  { %v1427_v45 = vpop.xlane.xlu0 %1426 }
 0x5c0   :  { %2224 = vlog2.f32 %v1427_v45 }
 0x5c3   :  { %v1429_v3 = vpop.xlane.xlu1 %1428 }
 0x5c4   :  { %2226 = vlog2.f32 %v1429_v3 }
 0x5c7   :  { %v1431_v54 = vpop.xlane.xlu0 %1430 }
 0x5c8   :  { %2228 = vlog2.f32 %v1431_v54 }
 0x5ca   :  { %v2225_v46 = vpop.eup %2224 }
 0x5cb   :  { %v1491_v7 = vmul.f32 0.6931472, %v2225_v46  ;;  %v1433_v22 = vpop.xlane.xlu1 %1432 }
 0x5cc   :  { %2230 = vlog2.f32 %v1433_v22 }
 0x5cd   :  { %v1554_v9 = vsub.f32 %v2816_v56, %v1491_v7 }
 0x5ce   :  { %v2227_v0 = vpop.eup %2226 }
 0x5cf   :  { %1586 = vst [vmem:[#allocation10] sm:$0xff] %v1554_v9  ;;  %v1493_v29 = vmul.f32 0.6931472, %v2227_v0  ;;  %v1435_v1 = vpop.xlane.xlu0 %1434 }
 0x5d0   :  { %2232 = vlog2.f32 %v1435_v1 }
 0x5d1   :  { %v1555_v10 = vsub.f32 %v2820_v59, %v1493_v29  ;;  %v1437_v14 = vpop.xlane.xlu1 %1436 }
 0x5d2   :  { %v2229_v37 = vpop.eup %2228  ;;  %2234 = vlog2.f32 %v1437_v14 }
 0x5d3   :  { %1587 = vst [vmem:[#allocation10 + $0x8] sm:$0xff] %v1555_v10  ;;  %v1495_v12 = vmul.f32 0.6931472, %v2229_v37 }
 0x5d5   :  { %v1556_v16 = vsub.f32 %v2824_v15, %v1495_v12 }
 0x5d6   :  { %v2231_v38 = vpop.eup %2230 }
 0x5d7   :  { %1588 = vst [vmem:[#allocation10 + $0x10] sm:$0xff] %v1556_v16  ;;  %v1497_v18 = vmul.f32 0.6931472, %v2231_v38  ;;  %v1439_v19 = vpop.xlane.xlu0 %1438 }
 0x5d8   :  { %2236 = vlog2.f32 %v1439_v19 }
 0x5d9   :  { %v1557_v56 = vsub.f32 %v2828_v20, %v1497_v18  ;;  %v1441_v21 = vpop.xlane.xlu1 %1440 }
 0x5da   :  { %v2233_v55 = vpop.eup %2232  ;;  %2238 = vlog2.f32 %v1441_v21 }
 0x5db   :  { %1589 = vst [vmem:[#allocation10 + $0x18] sm:$0xff] %v1557_v56  ;;  %v1499_v30 = vmul.f32 0.6931472, %v2233_v55 }
 0x5dc   :  { %v2235_v59 = vpop.eup %2234 }
 0x5dd   :  { %v1558_v13 = vsub.f32 %v2832_v8, %v1499_v30  ;;  %v1501_v33 = vmul.f32 0.6931472, %v2235_v59 }
 0x5df   :  { %1590 = vst [vmem:[#allocation10 + $0x20] sm:$0xff] %v1558_v13  ;;  %v1559_v36 = vsub.f32 %v2836_v52, %v1501_v33  ;;  %v1443_v15 = vpop.xlane.xlu0 %1442 }
 0x5e0   :  { %2240 = vlog2.f32 %v1443_v15 }
 0x5e1   :  { %1591 = vst [vmem:[#allocation10 + $0x28] sm:$0xff] %v1559_v36  ;;  %v1445_v41 = vpop.xlane.xlu1 %1444 }
 0x5e2   :  { %v2237_v27 = vpop.eup %2236  ;;  %2242 = vlog2.f32 %v1445_v41 }
 0x5e3   :  { %v1503_v47 = vmul.f32 0.6931472, %v2237_v27 }
 0x5e4   :  { %v2239_v20 = vpop.eup %2238 }
 0x5e5   :  { %v1560_v28 = vsub.f32 %v2840_v51, %v1503_v47  ;;  %v1505_v58 = vmul.f32 0.6931472, %v2239_v20 }
 0x5e7   :  { %1592 = vst [vmem:[#allocation10 + $0x30] sm:$0xff] %v1560_v28  ;;  %v1561_v60 = vsub.f32 %v2844_v17, %v1505_v58  ;;  %v1447_v63 = vpop.xlane.xlu0 %1446 }
 0x5e8   :  { %2244 = vlog2.f32 %v1447_v63 }
 0x5e9   :  { %1593 = vst [vmem:[#allocation10 + $0x38] sm:$0xff] %v1561_v60  ;;  %v1449_v8 = vpop.xlane.xlu1 %1448 }
 0x5ea   :  { %v2241_v48 = vpop.eup %2240  ;;  %2246 = vlog2.f32 %v1449_v8 }
 0x5eb   :  { %v1507_v52 = vmul.f32 0.6931472, %v2241_v48 }
 0x5ec   :  { %v2243_v45 = vpop.eup %2242 }
 0x5ed   :  { %v1562_v3 = vsub.f32 %v2848_v26, %v1507_v52  ;;  %v1509_v54 = vmul.f32 0.6931472, %v2243_v45 }
 0x5ef   :  { %1594 = vst [vmem:[#allocation10 + $0x40] sm:$0xff] %v1562_v3  ;;  %v1563_v46 = vsub.f32 %v2852_v32, %v1509_v54  ;;  %v1451_v7 = vpop.xlane.xlu0 %1450 }
 0x5f0   :  { %2248 = vlog2.f32 %v1451_v7 }
 0x5f1   :  { %1595 = vst [vmem:[#allocation10 + $0x48] sm:$0xff] %v1563_v46  ;;  %v1453_v51 = vpop.xlane.xlu1 %1452 }
 0x5f2   :  { %v2245_v22 = vpop.eup %2244  ;;  %2250 = vlog2.f32 %v1453_v51 }
 0x5f3   :  { %v1511_v17 = vmul.f32 0.6931472, %v2245_v22 }
 0x5f4   :  { %v2247_v9 = vpop.eup %2246 }
 0x5f5   :  { %v1564_v0 = vsub.f32 %v2856_v44, %v1511_v17  ;;  %v1513_v29 = vmul.f32 0.6931472, %v2247_v9 }
 0x5f7   :  { %1596 = vst [vmem:[#allocation10 + $0x50] sm:$0xff] %v1564_v0  ;;  %v1565_v1 = vsub.f32 %v2860_v24, %v1513_v29  ;;  %v1455_v10 = vpop.xlane.xlu0 %1454 }
 0x5f8   :  { %2252 = vlog2.f32 %v1455_v10 }
 0x5f9   :  { %1597 = vst [vmem:[#allocation10 + $0x58] sm:$0xff] %v1565_v1  ;;  %v1457_v26 = vpop.xlane.xlu1 %1456 }
 0x5fa   :  { %v2249_v14 = vpop.eup %2248  ;;  %2254 = vlog2.f32 %v1457_v26 }
 0x5fb   :  { %v1515_v32 = vmul.f32 0.6931472, %v2249_v14 }
 0x5fc   :  { %v2251_v37 = vpop.eup %2250 }
 0x5fd   :  { %v1566_v12 = vsub.f32 %v2864_v2, %v1515_v32  ;;  %v1517_v16 = vmul.f32 0.6931472, %v2251_v37 }
 0x5ff   :  { %1598 = vst [vmem:[#allocation10 + $0x60] sm:$0xff] %v1566_v12  ;;  %v1567_v38 = vsub.f32 %v2868_v4, %v1517_v16  ;;  %v1459_v18 = vpop.xlane.xlu0 %1458 }
 0x600   :  { %2256 = vlog2.f32 %v1459_v18 }
 0x601   :  { %1599 = vst [vmem:[#allocation10 + $0x68] sm:$0xff] %v1567_v38  ;;  %v1461_v44 = vpop.xlane.xlu1 %1460 }
 0x602   :  { %v2253_v19 = vpop.eup %2252  ;;  %2258 = vlog2.f32 %v1461_v44 }
 0x603   :  { %v1519_v24 = vmul.f32 0.6931472, %v2253_v19 }
 0x604   :  { %v2255_v56 = vpop.eup %2254 }
 0x605   :  { %v1568_v21 = vsub.f32 %v2872_v39, %v1519_v24  ;;  %v1521_v55 = vmul.f32 0.6931472, %v2255_v56 }
 0x607   :  { %1600 = vst [vmem:[#allocation10 + $0x70] sm:$0xff] %v1568_v21  ;;  %v1569_v30 = vsub.f32 %v2876_v31, %v1521_v55  ;;  %v1463_v59 = vpop.xlane.xlu0 %1462 }
 0x608   :  { %2260 = vlog2.f32 %v1463_v59 }
 0x609   :  { %1601 = vst [vmem:[#allocation10 + $0x78] sm:$0xff] %v1569_v30  ;;  %v1465_v2 = vpop.xlane.xlu1 %1464 }
 0x60a   :  { %v2257_v13 = vpop.eup %2256  ;;  %2262 = vlog2.f32 %v1465_v2 }
 0x60b   :  { %v1523_v4 = vmul.f32 0.6931472, %v2257_v13 }
 0x60c   :  { %v2259_v33 = vpop.eup %2258 }
 0x60d   :  { %v1570_v36 = vsub.f32 %v2880_v53, %v1523_v4  ;;  %v1525_v15 = vmul.f32 0.6931472, %v2259_v33 }
 0x60f   :  { %1602 = vst [vmem:[#allocation10 + $0x80] sm:$0xff] %v1570_v36  ;;  %v1571_v41 = vsub.f32 %v2884_v40, %v1525_v15  ;;  %v1467_v27 = vpop.xlane.xlu0 %1466 }
 0x610   :  { %2264 = vlog2.f32 %v1467_v27 }
 0x611   :  { %1603 = vst [vmem:[#allocation10 + $0x88] sm:$0xff] %v1571_v41  ;;  %v1469_v39 = vpop.xlane.xlu1 %1468 }
 0x612   :  { %v2261_v47 = vpop.eup %2260  ;;  %2266 = vlog2.f32 %v1469_v39 }
 0x613   :  { %v1527_v31 = vmul.f32 0.6931472, %v2261_v47 }
 0x614   :  { %v2263_v20 = vpop.eup %2262 }
 0x615   :  { %v1572_v28 = vsub.f32 %v2888_v43, %v1527_v31  ;;  %v1529_v58 = vmul.f32 0.6931472, %v2263_v20 }
 0x617   :  { %1604 = vst [vmem:[#allocation10 + $0x90] sm:$0xff] %v1572_v28  ;;  %v1573_v60 = vsub.f32 %v2892_v50, %v1529_v58  ;;  %v1471_v63 = vpop.xlane.xlu0 %1470 }
 0x618   :  { %2268 = vlog2.f32 %v1471_v63 }
 0x619   :  { %1605 = vst [vmem:[#allocation10 + $0x98] sm:$0xff] %v1573_v60  ;;  %v1473_v53 = vpop.xlane.xlu1 %1472 }
 0x61a   :  { %v2265_v8 = vpop.eup %2264  ;;  %2270 = vlog2.f32 %v1473_v53 }
 0x61b   :  { %v1531_v40 = vmul.f32 0.6931472, %v2265_v8 }
 0x61c   :  { %v2267_v48 = vpop.eup %2266 }
 0x61d   :  { %v1574_v52 = vsub.f32 %v2896_v61, %v1531_v40  ;;  %v1533_v45 = vmul.f32 0.6931472, %v2267_v48 }
 0x61f   :  { %1606 = vst [vmem:[#allocation10 + $0xa0] sm:$0xff] %v1574_v52  ;;  %v1575_v3 = vsub.f32 %v2900_v62, %v1533_v45  ;;  %v1475_v54 = vpop.xlane.xlu0 %1474 }
 0x620   :  { %2272 = vlog2.f32 %v1475_v54 }
 0x621   :  { %1607 = vst [vmem:[#allocation10 + $0xa8] sm:$0xff] %v1575_v3  ;;  %v1477_v43 = vpop.xlane.xlu1 %1476 }
 0x622   :  { %v2269_v46 = vpop.eup %2268  ;;  %2274 = vlog2.f32 %v1477_v43 }
 0x623   :  { %v1535_v50 = vmul.f32 0.6931472, %v2269_v46 }
 0x624   :  { %v2271_v7 = vpop.eup %2270 }
 0x625   :  { %v1576_v51 = vsub.f32 %v2904_v5, %v1535_v50  ;;  %v1537_v22 = vmul.f32 0.6931472, %v2271_v7 }
 0x627   :  { %1608 = vst [vmem:[#allocation10 + $0xb0] sm:$0xff] %v1576_v51  ;;  %v1577_v17 = vsub.f32 %v2908_v6, %v1537_v22  ;;  %v1479_v9 = vpop.xlane.xlu0 %1478 }
 0x628   :  { %2276 = vlog2.f32 %v1479_v9 }
 0x629   :  { %1609 = vst [vmem:[#allocation10 + $0xb8] sm:$0xff] %v1577_v17  ;;  %v1481_v61 = vpop.xlane.xlu1 %1480 }
 0x62a   :  { %v2273_v0 = vpop.eup %2272  ;;  %2278 = vlog2.f32 %v1481_v61 }
 0x62b   :  { %v1539_v62 = vmul.f32 0.6931472, %v2273_v0 }
 0x62c   :  { %v2275_v29 = vpop.eup %2274 }
 0x62d   :  { %v1578_v1 = vsub.f32 %v2912_v42, %v1539_v62  ;;  %v1541_v10 = vmul.f32 0.6931472, %v2275_v29 }
 0x62f   :  { %1610 = vst [vmem:[#allocation10 + $0xc0] sm:$0xff] %v1578_v1  ;;  %v1579_v26 = vsub.f32 %v2916_v49, %v1541_v10  ;;  %v1483_v14 = vpop.xlane.xlu0 %1482 }
 0x630   :  { %2280 = vlog2.f32 %v1483_v14 }
 0x631   :  { %1611 = vst [vmem:[#allocation10 + $0xc8] sm:$0xff] %v1579_v26  ;;  %v1485_v5 = vpop.xlane.xlu1 %1484 }
 0x632   :  { %v2277_v32 = vpop.eup %2276  ;;  %2282 = vlog2.f32 %v1485_v5 }
 0x633   :  { %v1543_v6 = vmul.f32 0.6931472, %v2277_v32 }
 0x634   :  { %v2279_v37 = vpop.eup %2278 }
 0x635   :  { %v1580_v12 = vsub.f32 %v2920_v57, %v1543_v6  ;;  %v1545_v16 = vmul.f32 0.6931472, %v2279_v37 }
 0x637   :  { %1612 = vst [vmem:[#allocation10 + $0xd0] sm:$0xff] %v1580_v12  ;;  %v1581_v38 = vsub.f32 %v2924_v11, %v1545_v16  ;;  %v1487_v18 = vpop.xlane.xlu0 %1486 }
 0x638   :  { %2284 = vlog2.f32 %v1487_v18 }
 0x639   :  { %1613 = vst [vmem:[#allocation10 + $0xd8] sm:$0xff] %v1581_v38  ;;  %v1489_v42 = vpop.xlane.xlu1 %1488 }
 0x63a   :  { %v2281_v44 = vpop.eup %2280  ;;  %2286 = vlog2.f32 %v1489_v42 }
 0x63b   :  { %v1547_v49 = vmul.f32 0.6931472, %v2281_v44 }
 0x63c   :  { %v2283_v19 = vpop.eup %2282 }
 0x63d   :  { %v1582_v24 = vsub.f32 %v2928_v23, %v1547_v49  ;;  %v1549_v56 = vmul.f32 0.6931472, %v2283_v19 }
 0x63f   :  { %1614 = vst [vmem:[#allocation10 + $0xe0] sm:$0xff] %v1582_v24  ;;  %v1583_v21 = vsub.f32 %v2932_v25, %v1549_v56 }
 0x641   :  { %1615 = vst [vmem:[#allocation10 + $0xe8] sm:$0xff] %v1583_v21 }
 0x642   :  { %v2285_v57 = vpop.eup %2284 }
 0x643   :  { %v1551_v55 = vmul.f32 0.6931472, %v2285_v57 }
 0x644   :  { %v2287_v30 = vpop.eup %2286 }
 0x645   :  { %v1584_v11 = vsub.f32 %v2936_v34, %v1551_v55  ;;  %v1553_v59 = vmul.f32 0.6931472, %v2287_v30 }
 0x647   :  { %1616 = vst [vmem:[#allocation10 + $0xf0] sm:$0xff] %v1584_v11  ;;  %v1585_v2 = vsub.f32 %v2940_v35, %v1553_v59 }
 0x649   :  { %1617 = vst [vmem:[#allocation10 + $0xf8] sm:$0xff] %v1585_v2 }
 0x64a   :  { %2387 = shalt.err (!%p2384_p8)
}
 0x64b   :  { %s2388_s29 = scalar_lea.hbm %s2996_s6, 4096 }
 0x64c   :  { %p2389_p9 = scmp.ne.s32.totalorder %s2996_s6, %s2388_s29  ;;  %p2392_p10 = scmp.lt.u32.totalorder %s2388_s29, %s2996_s6 }
 0x64e   :  { %p2394_p11 = pnand %p2392_p10, %p2389_p9 }
 0x650   :  { %2397 = shalt.err (!%p2394_p11)
}
 0x651   :  { %1629 = dma.vmem_to_hbm [thread:$0]  %s1624_s25, 4096, %s2996_s6, [#allocation4], %s2407_s7, %s2407_s7, %s2408_s8  }
 0x652   :  { %2404 = dma.done.wait [#allocation4], 4096  }
 0x653   :  { %2405 = vsyncadd [#allocation4], 4294963200 }
 0x654   :  { %1633 = vsyncpa [#allocation3], 1 }
 0x655   :  { %1634 = vsyncpa [#allocation6], 1 }
 0x656   :  { %1635 = vsyncpa [#allocation9], 1 }
 0x657   :  { %1636 = vsyncpa [#allocation4], 1 }

</bundles_post_ra>
